<compile_context>
chip_gen: v7x
topology: tpu7x:2x2x1
jax: 0.10.0
libtpu: 0.0.40
codegen_flags: <defaults>
</compile_context>

<pallas_src>
import functools
import math

import jax
import jax.numpy as jnp
from jax import lax
from jax.experimental import pallas as pl
from jax.experimental.pallas import tpu as pltpu


def _embedding_kernel(ids_ref, table_ref, pe_ref, o_ref, buf, sem,
                      *, tile_s, s_pad):
    """One grid step = `tile_s` consecutive tokens of one batch row.

    ids_ref:   [B * S_pad] int32 in SMEM (scalar prefetch, flattened)
    table_ref: [V, D] f32 raw HBM ref (manual DMA row gather)
    pe_ref:    [S_pad, D] f32 VMEM-resident positional encoding (fetched once)
    o_ref:     [tile_s, D] f32 VMEM output tile (batch dim squeezed)
    buf:       [2, tile_s, D] f32 VMEM double buffer for gathered rows
    sem:       [2] DMA semaphores (one per buffer slot)
    """
    b = pl.program_id(0)
    t = pl.program_id(1)
    n_tiles = pl.num_programs(1)

    slot = lax.rem(t, 2)
    next_slot = 1 - slot

    unroll = 8  # tile_s is always a multiple of 8 (enforced by the wrapper)

    def issue_tile(tile_idx, slot_idx):
        """Issue tile_s per-row gather DMAs (table -> buf[slot_idx])."""
        base = b * s_pad + tile_idx * tile_s

        def body(jj, carry):
            j0 = jj * unroll
            for u in range(unroll):
                j = j0 + u
                row = ids_ref[base + j]
                pltpu.make_async_copy(
                    table_ref.at[pl.ds(row, 1), :],
                    buf.at[slot_idx, pl.ds(j, 1), :],
                    sem.at[slot_idx],
                ).start()
            return carry

        lax.fori_loop(0, tile_s // unroll, body, 0)

    # Prime the pipeline at the first tile of this batch row.
    @pl.when(t == 0)
    def _():
        issue_tile(t, slot)

    # Cross-step double buffering: prefetch the next tile's rows (same batch
    # row) into the other slot.  All SMEM id reads happen before any DMA wait
    # below (keeps SMEM sst->sld forwarding intact).
    @pl.when(t + 1 < n_tiles)
    def _():
        issue_tile(t + 1, next_slot)

    # Wait for the current tile's gathers.  Every issued copy has identical
    # size and shares sem[slot], so waiting once per issued copy (with any
    # same-sized descriptor) exactly balances the semaphore.
    def wait_body(jj, carry):
        for _ in range(unroll):
            pltpu.make_async_copy(
                table_ref.at[pl.ds(0, 1), :],
                buf.at[slot, pl.ds(0, 1), :],
                sem.at[slot],
            ).wait()
        return carry

    lax.fori_loop(0, tile_s // unroll, wait_body, 0)

    # Add the VMEM-resident PE tile and store the lane-dense output block.
    pos = pl.multiple_of(t * tile_s, tile_s)
    o_ref[...] = buf[slot] + pe_ref[pl.ds(pos, tile_s), :]


def _sinusoidal_pe(length, d):
    """PositionalEmbedding buffer: pe[:,0::2]=sin, pe[:,1::2]=cos."""
    position = jnp.arange(length, dtype=jnp.float32)[:, None]
    div_term = jnp.exp(
        jnp.arange(0, d, 2, dtype=jnp.float32) * (-math.log(10000.0) / d))
    ang = position * div_term                       # [length, d//2]
    pe = jnp.zeros((length, d), jnp.float32)
    pe = pe.at[:, 0::2].set(jnp.sin(ang))
    pe = pe.at[:, 1::2].set(jnp.cos(ang))
    return pe


@functools.partial(jax.jit, static_argnames=("tile_s",))
def embedding_forward(ids, mask, token_type_ids, table, *, tile_s=256):
    """ids: [B, S] int; table: [V, D] f32.  Returns (out,) with out [B, S, D]."""
    del mask, token_type_ids  # unused by the reference forward
    B, S = ids.shape
    V, D = table.shape

    # Clamp the requested tile to the (8-aligned) sequence length so tiny
    # sequences do not blow up the padding; keep it a multiple of 8 for the
    # (8, 128) block constraint.  Default 256 amortises the per-step overhead
    # and keeps 256 gather DMAs in flight; VMEM use stays far below even
    # v7x's 32 MiB scoped default.
    s_aligned = ((S + 7) // 8) * 8
    tile = min(tile_s, s_aligned)
    tile = ((tile + 7) // 8) * 8
    assert tile % 8 == 0
    n_tiles = pl.cdiv(S, tile)
    S_pad = n_tiles * tile

    # Clamp ids so untrusted inputs cannot trigger OOB gather DMAs; pad with
    # id 0 (padding row) — padded positions are sliced off below.
    ids_i32 = jnp.clip(ids.astype(jnp.int32), 0, V - 1)
    if S_pad != S:
        ids_i32 = jnp.pad(ids_i32, ((0, 0), (0, S_pad - S)))
    ids_flat = ids_i32.reshape(-1)                  # 1-D SMEM: no sublane pad

    pe = _sinusoidal_pe(S_pad, D)                   # [S_pad, D] (small)

    out = pl.pallas_call(
        functools.partial(_embedding_kernel, tile_s=tile, s_pad=S_pad),
        out_shape=jax.ShapeDtypeStruct((B, S_pad, D), jnp.float32),
        grid_spec=pltpu.PrefetchScalarGridSpec(
            num_scalar_prefetch=1,                  # ids -> SMEM
            grid=(B, n_tiles),
            in_specs=[
                pl.BlockSpec(memory_space=pl.ANY),  # embedding table (HBM)
                # Full-array PE block: block index never changes, so it is
                # DMA'd to VMEM once and re-used across all grid steps.
                pl.BlockSpec((S_pad, D), lambda b, t, ids: (0, 0)),
            ],
            out_specs=pl.BlockSpec((None, tile, D),
                                   lambda b, t, ids: (b, t, 0)),
            scratch_shapes=[
                pltpu.VMEM((2, tile, D), jnp.float32),   # gather double buffer
                pltpu.SemaphoreType.DMA((2,)),           # one sem per slot
            ],
        ),
        compiler_params=pltpu.CompilerParams(
            # Tile axis must stay "arbitrary": the cross-step gather prefetch
            # may not cross a megacore chunk boundary.  Batch axis is parallel.
            dimension_semantics=("parallel", "arbitrary"),
            vmem_limit_bytes=32 * 1024 * 1024,
        ),
    )(ids_flat, table, pe)

    return (out[:, :S, :],)


def init_params(key, vocab_size=30522, d_model=256):
    """nn.Embedding(30522, 256, padding_idx=0): N(0,1) init, row 0 zeroed."""
    w = jax.random.normal(key, (vocab_size, d_model), jnp.float32)
    w = w.at[0].set(0.0)
    return w


def _reference(ids, table):
    B, S = ids.shape
    D = table.shape[1]
    pe = _sinusoidal_pe(S, D)
    return table[ids] + pe[None]


if __name__ == "__main__":
    B, S, V, D = 2, 37, 30522, 256

    key = jax.random.PRNGKey(0)
    k_tab, k_ids = jax.random.split(key)
    table = init_params(k_tab, V, D)
    ids = jax.random.randint(k_ids, (B, S), 0, V, dtype=jnp.int32)
    mask = jnp.ones((B, S), jnp.int32)             # unused by forward
    token_type_ids = jnp.zeros((B, S), jnp.int32)  # unused by forward

    ref = _reference(ids, table)

    # Small tile: exercises multi-tile rows, the cross-step double-buffered
    # gather path and sequence padding (S=37 -> S_pad=48, 3 tiles of 16).
    (out,) = embedding_forward(ids, mask, token_type_ids, table, tile_s=16)
    jax.block_until_ready(out)
    assert out.shape == (B, S, D), out.shape
    err = jnp.max(jnp.abs(out - ref))
    assert err < 1e-5, err

    # Default (large-tile) path, clamped to the short demo sequence.
    (out2,) = embedding_forward(ids, mask, token_type_ids, table)
    jax.block_until_ready(out2)
    err2 = jnp.max(jnp.abs(out2 - ref))
    assert err2 < 1e-5, err2

    print("KERNEL_OK")
</pallas_src>

<mosaic_0001>
module attributes {stable_mosaic.version = 11 : i64} {
  func.func @_embedding_kernel(%arg0: i32, %arg1: i32, %arg2: memref<96xi32, #tpu.memory_space<smem>>, %arg3: memref<30522x256xf32, #tpu.memory_space<any>>, %arg4: memref<48x256xf32, #tpu.memory_space<vmem>>, %arg5: memref<1x16x256xf32, #tpu.memory_space<vmem>>, %arg6: memref<2x16x256xf32, #tpu.memory_space<vmem>>, %arg7: memref<2x!tpu.dma_semaphore, #tpu.memory_space<semaphore_mem>>) attributes {dimension_semantics = [#tpu.dimension_semantics<parallel>, #tpu.dimension_semantics<arbitrary>], iteration_bounds = array<i64: 2, 3>, scalar_prefetch = 1 : i64, scratch_operands = 2 : i64, tpu.core_type = #tpu.core_type<tc>, window_params = [{}, {pipeline_mode = #tpu.pipeline_mode<synchronous>, transform_indices = @transform_1, window_bounds = array<i64: 48, 256>}, {transform_indices = @transform_2, window_bounds = array<i64: 1, 16, 256>}]} {
    %c2_i32 = arith.constant 2 : i32
    %0 = arith.remsi %arg1, %c2_i32 : i32
    %c1_i32 = arith.constant 1 : i32
    %1 = arith.subi %c1_i32, %0 : i32
    %c0_i32 = arith.constant 0 : i32
    %2 = arith.cmpi eq, %arg1, %c0_i32 : i32
    %3 = arith.extui %2 : i1 to i32
    %c0_i32_0 = arith.constant 0 : i32
    %4 = arith.cmpi ne, %3, %c0_i32_0 : i32
    scf.if %4 {
      %c48_i32 = arith.constant 48 : i32
      %21 = arith.muli %arg0, %c48_i32 : i32
      %c16_i32_11 = arith.constant 16 : i32
      %22 = arith.muli %arg1, %c16_i32_11 : i32
      %23 = arith.addi %21, %22 : i32
      %c0_i32_12 = arith.constant 0 : i32
      %c2_i32_13 = arith.constant 2 : i32
      %24 = arith.addi %c0_i32_12, %c2_i32_13 : i32
      %c1_i32_14 = arith.constant 1 : i32
      scf.for %arg8 = %c0_i32_12 to %24 step %c1_i32_14  : i32 {
        %c8_i32 = arith.constant 8 : i32
        %25 = arith.muli %arg8, %c8_i32 : i32
        %c0_i32_16 = arith.constant 0 : i32
        %26 = arith.addi %25, %c0_i32_16 : i32
        %27 = arith.addi %23, %26 : i32
        %28 = arith.index_cast %27 : i32 to index
        %29 = memref.load %arg2[%28] : memref<96xi32, #tpu.memory_space<smem>>
        %c0_i32_17 = arith.constant 0 : i32
        %30 = tpu.memref_slice %arg3[%29, %c0_i32_17] : memref<30522x256xf32, #tpu.memory_space<any>> -> memref<1x256xf32, #tpu.memory_space<any>>
        %c0_i32_18 = arith.constant 0 : i32
        %31 = tpu.memref_slice %arg6[%0, %26, %c0_i32_18] : memref<2x16x256xf32, #tpu.memory_space<vmem>> -> memref<1x1x256xf32, #tpu.memory_space<vmem>>
        %32 = tpu.memref_squeeze %31 : memref<1x1x256xf32, #tpu.memory_space<vmem>> -> memref<1x256xf32, #tpu.memory_space<vmem>>
        %33 = tpu.memref_slice %arg7[%0] : memref<2x!tpu.dma_semaphore, #tpu.memory_space<semaphore_mem>> -> memref<1x!tpu.dma_semaphore, #tpu.memory_space<semaphore_mem>>
        %34 = tpu.memref_squeeze %33 : memref<1x!tpu.dma_semaphore, #tpu.memory_space<semaphore_mem>> -> memref<!tpu.dma_semaphore, #tpu.memory_space<semaphore_mem>>
        tpu.enqueue_dma source(%30 : memref<1x256xf32, #tpu.memory_space<any>>) target(%32 : memref<1x256xf32, #tpu.memory_space<vmem>>) target_semaphore(%34 : memref<!tpu.dma_semaphore, #tpu.memory_space<semaphore_mem>>)
        %c1_i32_19 = arith.constant 1 : i32
        %35 = arith.addi %25, %c1_i32_19 : i32
        %36 = arith.addi %23, %35 : i32
        %37 = arith.index_cast %36 : i32 to index
        %38 = memref.load %arg2[%37] : memref<96xi32, #tpu.memory_space<smem>>
        %c0_i32_20 = arith.constant 0 : i32
        %39 = tpu.memref_slice %arg3[%38, %c0_i32_20] : memref<30522x256xf32, #tpu.memory_space<any>> -> memref<1x256xf32, #tpu.memory_space<any>>
        %c0_i32_21 = arith.constant 0 : i32
        %40 = tpu.memref_slice %arg6[%0, %35, %c0_i32_21] : memref<2x16x256xf32, #tpu.memory_space<vmem>> -> memref<1x1x256xf32, #tpu.memory_space<vmem>>
        %41 = tpu.memref_squeeze %40 : memref<1x1x256xf32, #tpu.memory_space<vmem>> -> memref<1x256xf32, #tpu.memory_space<vmem>>
        %42 = tpu.memref_slice %arg7[%0] : memref<2x!tpu.dma_semaphore, #tpu.memory_space<semaphore_mem>> -> memref<1x!tpu.dma_semaphore, #tpu.memory_space<semaphore_mem>>
        %43 = tpu.memref_squeeze %42 : memref<1x!tpu.dma_semaphore, #tpu.memory_space<semaphore_mem>> -> memref<!tpu.dma_semaphore, #tpu.memory_space<semaphore_mem>>
        tpu.enqueue_dma source(%39 : memref<1x256xf32, #tpu.memory_space<any>>) target(%41 : memref<1x256xf32, #tpu.memory_space<vmem>>) target_semaphore(%43 : memref<!tpu.dma_semaphore, #tpu.memory_space<semaphore_mem>>)
        %c2_i32_22 = arith.constant 2 : i32
        %44 = arith.addi %25, %c2_i32_22 : i32
        %45 = arith.addi %23, %44 : i32
        %46 = arith.index_cast %45 : i32 to index
        %47 = memref.load %arg2[%46] : memref<96xi32, #tpu.memory_space<smem>>
        %c0_i32_23 = arith.constant 0 : i32
        %48 = tpu.memref_slice %arg3[%47, %c0_i32_23] : memref<30522x256xf32, #tpu.memory_space<any>> -> memref<1x256xf32, #tpu.memory_space<any>>
        %c0_i32_24 = arith.constant 0 : i32
        %49 = tpu.memref_slice %arg6[%0, %44, %c0_i32_24] : memref<2x16x256xf32, #tpu.memory_space<vmem>> -> memref<1x1x256xf32, #tpu.memory_space<vmem>>
        %50 = tpu.memref_squeeze %49 : memref<1x1x256xf32, #tpu.memory_space<vmem>> -> memref<1x256xf32, #tpu.memory_space<vmem>>
        %51 = tpu.memref_slice %arg7[%0] : memref<2x!tpu.dma_semaphore, #tpu.memory_space<semaphore_mem>> -> memref<1x!tpu.dma_semaphore, #tpu.memory_space<semaphore_mem>>
        %52 = tpu.memref_squeeze %51 : memref<1x!tpu.dma_semaphore, #tpu.memory_space<semaphore_mem>> -> memref<!tpu.dma_semaphore, #tpu.memory_space<semaphore_mem>>
        tpu.enqueue_dma source(%48 : memref<1x256xf32, #tpu.memory_space<any>>) target(%50 : memref<1x256xf32, #tpu.memory_space<vmem>>) target_semaphore(%52 : memref<!tpu.dma_semaphore, #tpu.memory_space<semaphore_mem>>)
        %c3_i32_25 = arith.constant 3 : i32
        %53 = arith.addi %25, %c3_i32_25 : i32
        %54 = arith.addi %23, %53 : i32
        %55 = arith.index_cast %54 : i32 to index
        %56 = memref.load %arg2[%55] : memref<96xi32, #tpu.memory_space<smem>>
        %c0_i32_26 = arith.constant 0 : i32
        %57 = tpu.memref_slice %arg3[%56, %c0_i32_26] : memref<30522x256xf32, #tpu.memory_space<any>> -> memref<1x256xf32, #tpu.memory_space<any>>
        %c0_i32_27 = arith.constant 0 : i32
        %58 = tpu.memref_slice %arg6[%0, %53, %c0_i32_27] : memref<2x16x256xf32, #tpu.memory_space<vmem>> -> memref<1x1x256xf32, #tpu.memory_space<vmem>>
        %59 = tpu.memref_squeeze %58 : memref<1x1x256xf32, #tpu.memory_space<vmem>> -> memref<1x256xf32, #tpu.memory_space<vmem>>
        %60 = tpu.memref_slice %arg7[%0] : memref<2x!tpu.dma_semaphore, #tpu.memory_space<semaphore_mem>> -> memref<1x!tpu.dma_semaphore, #tpu.memory_space<semaphore_mem>>
        %61 = tpu.memref_squeeze %60 : memref<1x!tpu.dma_semaphore, #tpu.memory_space<semaphore_mem>> -> memref<!tpu.dma_semaphore, #tpu.memory_space<semaphore_mem>>
        tpu.enqueue_dma source(%57 : memref<1x256xf32, #tpu.memory_space<any>>) target(%59 : memref<1x256xf32, #tpu.memory_space<vmem>>) target_semaphore(%61 : memref<!tpu.dma_semaphore, #tpu.memory_space<semaphore_mem>>)
        %c4_i32 = arith.constant 4 : i32
        %62 = arith.addi %25, %c4_i32 : i32
        %63 = arith.addi %23, %62 : i32
        %64 = arith.index_cast %63 : i32 to index
        %65 = memref.load %arg2[%64] : memref<96xi32, #tpu.memory_space<smem>>
        %c0_i32_28 = arith.constant 0 : i32
        %66 = tpu.memref_slice %arg3[%65, %c0_i32_28] : memref<30522x256xf32, #tpu.memory_space<any>> -> memref<1x256xf32, #tpu.memory_space<any>>
        %c0_i32_29 = arith.constant 0 : i32
        %67 = tpu.memref_slice %arg6[%0, %62, %c0_i32_29] : memref<2x16x256xf32, #tpu.memory_space<vmem>> -> memref<1x1x256xf32, #tpu.memory_space<vmem>>
        %68 = tpu.memref_squeeze %67 : memref<1x1x256xf32, #tpu.memory_space<vmem>> -> memref<1x256xf32, #tpu.memory_space<vmem>>
        %69 = tpu.memref_slice %arg7[%0] : memref<2x!tpu.dma_semaphore, #tpu.memory_space<semaphore_mem>> -> memref<1x!tpu.dma_semaphore, #tpu.memory_space<semaphore_mem>>
        %70 = tpu.memref_squeeze %69 : memref<1x!tpu.dma_semaphore, #tpu.memory_space<semaphore_mem>> -> memref<!tpu.dma_semaphore, #tpu.memory_space<semaphore_mem>>
        tpu.enqueue_dma source(%66 : memref<1x256xf32, #tpu.memory_space<any>>) target(%68 : memref<1x256xf32, #tpu.memory_space<vmem>>) target_semaphore(%70 : memref<!tpu.dma_semaphore, #tpu.memory_space<semaphore_mem>>)
        %c5_i32 = arith.constant 5 : i32
        %71 = arith.addi %25, %c5_i32 : i32
        %72 = arith.addi %23, %71 : i32
        %73 = arith.index_cast %72 : i32 to index
        %74 = memref.load %arg2[%73] : memref<96xi32, #tpu.memory_space<smem>>
        %c0_i32_30 = arith.constant 0 : i32
        %75 = tpu.memref_slice %arg3[%74, %c0_i32_30] : memref<30522x256xf32, #tpu.memory_space<any>> -> memref<1x256xf32, #tpu.memory_space<any>>
        %c0_i32_31 = arith.constant 0 : i32
        %76 = tpu.memref_slice %arg6[%0, %71, %c0_i32_31] : memref<2x16x256xf32, #tpu.memory_space<vmem>> -> memref<1x1x256xf32, #tpu.memory_space<vmem>>
        %77 = tpu.memref_squeeze %76 : memref<1x1x256xf32, #tpu.memory_space<vmem>> -> memref<1x256xf32, #tpu.memory_space<vmem>>
        %78 = tpu.memref_slice %arg7[%0] : memref<2x!tpu.dma_semaphore, #tpu.memory_space<semaphore_mem>> -> memref<1x!tpu.dma_semaphore, #tpu.memory_space<semaphore_mem>>
        %79 = tpu.memref_squeeze %78 : memref<1x!tpu.dma_semaphore, #tpu.memory_space<semaphore_mem>> -> memref<!tpu.dma_semaphore, #tpu.memory_space<semaphore_mem>>
        tpu.enqueue_dma source(%75 : memref<1x256xf32, #tpu.memory_space<any>>) target(%77 : memref<1x256xf32, #tpu.memory_space<vmem>>) target_semaphore(%79 : memref<!tpu.dma_semaphore, #tpu.memory_space<semaphore_mem>>)
        %c6_i32 = arith.constant 6 : i32
        %80 = arith.addi %25, %c6_i32 : i32
        %81 = arith.addi %23, %80 : i32
        %82 = arith.index_cast %81 : i32 to index
        %83 = memref.load %arg2[%82] : memref<96xi32, #tpu.memory_space<smem>>
        %c0_i32_32 = arith.constant 0 : i32
        %84 = tpu.memref_slice %arg3[%83, %c0_i32_32] : memref<30522x256xf32, #tpu.memory_space<any>> -> memref<1x256xf32, #tpu.memory_space<any>>
        %c0_i32_33 = arith.constant 0 : i32
        %85 = tpu.memref_slice %arg6[%0, %80, %c0_i32_33] : memref<2x16x256xf32, #tpu.memory_space<vmem>> -> memref<1x1x256xf32, #tpu.memory_space<vmem>>
        %86 = tpu.memref_squeeze %85 : memref<1x1x256xf32, #tpu.memory_space<vmem>> -> memref<1x256xf32, #tpu.memory_space<vmem>>
        %87 = tpu.memref_slice %arg7[%0] : memref<2x!tpu.dma_semaphore, #tpu.memory_space<semaphore_mem>> -> memref<1x!tpu.dma_semaphore, #tpu.memory_space<semaphore_mem>>
        %88 = tpu.memref_squeeze %87 : memref<1x!tpu.dma_semaphore, #tpu.memory_space<semaphore_mem>> -> memref<!tpu.dma_semaphore, #tpu.memory_space<semaphore_mem>>
        tpu.enqueue_dma source(%84 : memref<1x256xf32, #tpu.memory_space<any>>) target(%86 : memref<1x256xf32, #tpu.memory_space<vmem>>) target_semaphore(%88 : memref<!tpu.dma_semaphore, #tpu.memory_space<semaphore_mem>>)
        %c7_i32 = arith.constant 7 : i32
        %89 = arith.addi %25, %c7_i32 : i32
        %90 = arith.addi %23, %89 : i32
        %91 = arith.index_cast %90 : i32 to index
        %92 = memref.load %arg2[%91] : memref<96xi32, #tpu.memory_space<smem>>
        %c0_i32_34 = arith.constant 0 : i32
        %93 = tpu.memref_slice %arg3[%92, %c0_i32_34] : memref<30522x256xf32, #tpu.memory_space<any>> -> memref<1x256xf32, #tpu.memory_space<any>>
        %c0_i32_35 = arith.constant 0 : i32
        %94 = tpu.memref_slice %arg6[%0, %89, %c0_i32_35] : memref<2x16x256xf32, #tpu.memory_space<vmem>> -> memref<1x1x256xf32, #tpu.memory_space<vmem>>
        %95 = tpu.memref_squeeze %94 : memref<1x1x256xf32, #tpu.memory_space<vmem>> -> memref<1x256xf32, #tpu.memory_space<vmem>>
        %96 = tpu.memref_slice %arg7[%0] : memref<2x!tpu.dma_semaphore, #tpu.memory_space<semaphore_mem>> -> memref<1x!tpu.dma_semaphore, #tpu.memory_space<semaphore_mem>>
        %97 = tpu.memref_squeeze %96 : memref<1x!tpu.dma_semaphore, #tpu.memory_space<semaphore_mem>> -> memref<!tpu.dma_semaphore, #tpu.memory_space<semaphore_mem>>
        tpu.enqueue_dma source(%93 : memref<1x256xf32, #tpu.memory_space<any>>) target(%95 : memref<1x256xf32, #tpu.memory_space<vmem>>) target_semaphore(%97 : memref<!tpu.dma_semaphore, #tpu.memory_space<semaphore_mem>>)
      }
      %c2_i32_15 = arith.constant 2 : i32
    } else {
    }
    %c1_i32_1 = arith.constant 1 : i32
    %5 = arith.addi %arg1, %c1_i32_1 : i32
    %c3_i32 = arith.constant 3 : i32
    %6 = arith.cmpi slt, %5, %c3_i32 : i32
    %7 = arith.extui %6 : i1 to i32
    %c0_i32_2 = arith.constant 0 : i32
    %8 = arith.cmpi ne, %7, %c0_i32_2 : i32
    scf.if %8 {
      %c1_i32_11 = arith.constant 1 : i32
      %21 = arith.addi %arg1, %c1_i32_11 : i32
      %c48_i32 = arith.constant 48 : i32
      %22 = arith.muli %arg0, %c48_i32 : i32
      %c16_i32_12 = arith.constant 16 : i32
      %23 = arith.muli %21, %c16_i32_12 : i32
      %24 = arith.addi %22, %23 : i32
      %c0_i32_13 = arith.constant 0 : i32
      %c2_i32_14 = arith.constant 2 : i32
      %25 = arith.addi %c0_i32_13, %c2_i32_14 : i32
      %c1_i32_15 = arith.constant 1 : i32
      scf.for %arg8 = %c0_i32_13 to %25 step %c1_i32_15  : i32 {
        %c8_i32 = arith.constant 8 : i32
        %26 = arith.muli %arg8, %c8_i32 : i32
        %c0_i32_17 = arith.constant 0 : i32
        %27 = arith.addi %26, %c0_i32_17 : i32
        %28 = arith.addi %24, %27 : i32
        %29 = arith.index_cast %28 : i32 to index
        %30 = memref.load %arg2[%29] : memref<96xi32, #tpu.memory_space<smem>>
        %c0_i32_18 = arith.constant 0 : i32
        %31 = tpu.memref_slice %arg3[%30, %c0_i32_18] : memref<30522x256xf32, #tpu.memory_space<any>> -> memref<1x256xf32, #tpu.memory_space<any>>
        %c0_i32_19 = arith.constant 0 : i32
        %32 = tpu.memref_slice %arg6[%1, %27, %c0_i32_19] : memref<2x16x256xf32, #tpu.memory_space<vmem>> -> memref<1x1x256xf32, #tpu.memory_space<vmem>>
        %33 = tpu.memref_squeeze %32 : memref<1x1x256xf32, #tpu.memory_space<vmem>> -> memref<1x256xf32, #tpu.memory_space<vmem>>
        %34 = tpu.memref_slice %arg7[%1] : memref<2x!tpu.dma_semaphore, #tpu.memory_space<semaphore_mem>> -> memref<1x!tpu.dma_semaphore, #tpu.memory_space<semaphore_mem>>
        %35 = tpu.memref_squeeze %34 : memref<1x!tpu.dma_semaphore, #tpu.memory_space<semaphore_mem>> -> memref<!tpu.dma_semaphore, #tpu.memory_space<semaphore_mem>>
        tpu.enqueue_dma source(%31 : memref<1x256xf32, #tpu.memory_space<any>>) target(%33 : memref<1x256xf32, #tpu.memory_space<vmem>>) target_semaphore(%35 : memref<!tpu.dma_semaphore, #tpu.memory_space<semaphore_mem>>)
        %c1_i32_20 = arith.constant 1 : i32
        %36 = arith.addi %26, %c1_i32_20 : i32
        %37 = arith.addi %24, %36 : i32
        %38 = arith.index_cast %37 : i32 to index
        %39 = memref.load %arg2[%38] : memref<96xi32, #tpu.memory_space<smem>>
        %c0_i32_21 = arith.constant 0 : i32
        %40 = tpu.memref_slice %arg3[%39, %c0_i32_21] : memref<30522x256xf32, #tpu.memory_space<any>> -> memref<1x256xf32, #tpu.memory_space<any>>
        %c0_i32_22 = arith.constant 0 : i32
        %41 = tpu.memref_slice %arg6[%1, %36, %c0_i32_22] : memref<2x16x256xf32, #tpu.memory_space<vmem>> -> memref<1x1x256xf32, #tpu.memory_space<vmem>>
        %42 = tpu.memref_squeeze %41 : memref<1x1x256xf32, #tpu.memory_space<vmem>> -> memref<1x256xf32, #tpu.memory_space<vmem>>
        %43 = tpu.memref_slice %arg7[%1] : memref<2x!tpu.dma_semaphore, #tpu.memory_space<semaphore_mem>> -> memref<1x!tpu.dma_semaphore, #tpu.memory_space<semaphore_mem>>
        %44 = tpu.memref_squeeze %43 : memref<1x!tpu.dma_semaphore, #tpu.memory_space<semaphore_mem>> -> memref<!tpu.dma_semaphore, #tpu.memory_space<semaphore_mem>>
        tpu.enqueue_dma source(%40 : memref<1x256xf32, #tpu.memory_space<any>>) target(%42 : memref<1x256xf32, #tpu.memory_space<vmem>>) target_semaphore(%44 : memref<!tpu.dma_semaphore, #tpu.memory_space<semaphore_mem>>)
        %c2_i32_23 = arith.constant 2 : i32
        %45 = arith.addi %26, %c2_i32_23 : i32
        %46 = arith.addi %24, %45 : i32
        %47 = arith.index_cast %46 : i32 to index
        %48 = memref.load %arg2[%47] : memref<96xi32, #tpu.memory_space<smem>>
        %c0_i32_24 = arith.constant 0 : i32
        %49 = tpu.memref_slice %arg3[%48, %c0_i32_24] : memref<30522x256xf32, #tpu.memory_space<any>> -> memref<1x256xf32, #tpu.memory_space<any>>
        %c0_i32_25 = arith.constant 0 : i32
        %50 = tpu.memref_slice %arg6[%1, %45, %c0_i32_25] : memref<2x16x256xf32, #tpu.memory_space<vmem>> -> memref<1x1x256xf32, #tpu.memory_space<vmem>>
        %51 = tpu.memref_squeeze %50 : memref<1x1x256xf32, #tpu.memory_space<vmem>> -> memref<1x256xf32, #tpu.memory_space<vmem>>
        %52 = tpu.memref_slice %arg7[%1] : memref<2x!tpu.dma_semaphore, #tpu.memory_space<semaphore_mem>> -> memref<1x!tpu.dma_semaphore, #tpu.memory_space<semaphore_mem>>
        %53 = tpu.memref_squeeze %52 : memref<1x!tpu.dma_semaphore, #tpu.memory_space<semaphore_mem>> -> memref<!tpu.dma_semaphore, #tpu.memory_space<semaphore_mem>>
        tpu.enqueue_dma source(%49 : memref<1x256xf32, #tpu.memory_space<any>>) target(%51 : memref<1x256xf32, #tpu.memory_space<vmem>>) target_semaphore(%53 : memref<!tpu.dma_semaphore, #tpu.memory_space<semaphore_mem>>)
        %c3_i32_26 = arith.constant 3 : i32
        %54 = arith.addi %26, %c3_i32_26 : i32
        %55 = arith.addi %24, %54 : i32
        %56 = arith.index_cast %55 : i32 to index
        %57 = memref.load %arg2[%56] : memref<96xi32, #tpu.memory_space<smem>>
        %c0_i32_27 = arith.constant 0 : i32
        %58 = tpu.memref_slice %arg3[%57, %c0_i32_27] : memref<30522x256xf32, #tpu.memory_space<any>> -> memref<1x256xf32, #tpu.memory_space<any>>
        %c0_i32_28 = arith.constant 0 : i32
        %59 = tpu.memref_slice %arg6[%1, %54, %c0_i32_28] : memref<2x16x256xf32, #tpu.memory_space<vmem>> -> memref<1x1x256xf32, #tpu.memory_space<vmem>>
        %60 = tpu.memref_squeeze %59 : memref<1x1x256xf32, #tpu.memory_space<vmem>> -> memref<1x256xf32, #tpu.memory_space<vmem>>
        %61 = tpu.memref_slice %arg7[%1] : memref<2x!tpu.dma_semaphore, #tpu.memory_space<semaphore_mem>> -> memref<1x!tpu.dma_semaphore, #tpu.memory_space<semaphore_mem>>
        %62 = tpu.memref_squeeze %61 : memref<1x!tpu.dma_semaphore, #tpu.memory_space<semaphore_mem>> -> memref<!tpu.dma_semaphore, #tpu.memory_space<semaphore_mem>>
        tpu.enqueue_dma source(%58 : memref<1x256xf32, #tpu.memory_space<any>>) target(%60 : memref<1x256xf32, #tpu.memory_space<vmem>>) target_semaphore(%62 : memref<!tpu.dma_semaphore, #tpu.memory_space<semaphore_mem>>)
        %c4_i32 = arith.constant 4 : i32
        %63 = arith.addi %26, %c4_i32 : i32
        %64 = arith.addi %24, %63 : i32
        %65 = arith.index_cast %64 : i32 to index
        %66 = memref.load %arg2[%65] : memref<96xi32, #tpu.memory_space<smem>>
        %c0_i32_29 = arith.constant 0 : i32
        %67 = tpu.memref_slice %arg3[%66, %c0_i32_29] : memref<30522x256xf32, #tpu.memory_space<any>> -> memref<1x256xf32, #tpu.memory_space<any>>
        %c0_i32_30 = arith.constant 0 : i32
        %68 = tpu.memref_slice %arg6[%1, %63, %c0_i32_30] : memref<2x16x256xf32, #tpu.memory_space<vmem>> -> memref<1x1x256xf32, #tpu.memory_space<vmem>>
        %69 = tpu.memref_squeeze %68 : memref<1x1x256xf32, #tpu.memory_space<vmem>> -> memref<1x256xf32, #tpu.memory_space<vmem>>
        %70 = tpu.memref_slice %arg7[%1] : memref<2x!tpu.dma_semaphore, #tpu.memory_space<semaphore_mem>> -> memref<1x!tpu.dma_semaphore, #tpu.memory_space<semaphore_mem>>
        %71 = tpu.memref_squeeze %70 : memref<1x!tpu.dma_semaphore, #tpu.memory_space<semaphore_mem>> -> memref<!tpu.dma_semaphore, #tpu.memory_space<semaphore_mem>>
        tpu.enqueue_dma source(%67 : memref<1x256xf32, #tpu.memory_space<any>>) target(%69 : memref<1x256xf32, #tpu.memory_space<vmem>>) target_semaphore(%71 : memref<!tpu.dma_semaphore, #tpu.memory_space<semaphore_mem>>)
        %c5_i32 = arith.constant 5 : i32
        %72 = arith.addi %26, %c5_i32 : i32
        %73 = arith.addi %24, %72 : i32
        %74 = arith.index_cast %73 : i32 to index
        %75 = memref.load %arg2[%74] : memref<96xi32, #tpu.memory_space<smem>>
        %c0_i32_31 = arith.constant 0 : i32
        %76 = tpu.memref_slice %arg3[%75, %c0_i32_31] : memref<30522x256xf32, #tpu.memory_space<any>> -> memref<1x256xf32, #tpu.memory_space<any>>
        %c0_i32_32 = arith.constant 0 : i32
        %77 = tpu.memref_slice %arg6[%1, %72, %c0_i32_32] : memref<2x16x256xf32, #tpu.memory_space<vmem>> -> memref<1x1x256xf32, #tpu.memory_space<vmem>>
        %78 = tpu.memref_squeeze %77 : memref<1x1x256xf32, #tpu.memory_space<vmem>> -> memref<1x256xf32, #tpu.memory_space<vmem>>
        %79 = tpu.memref_slice %arg7[%1] : memref<2x!tpu.dma_semaphore, #tpu.memory_space<semaphore_mem>> -> memref<1x!tpu.dma_semaphore, #tpu.memory_space<semaphore_mem>>
        %80 = tpu.memref_squeeze %79 : memref<1x!tpu.dma_semaphore, #tpu.memory_space<semaphore_mem>> -> memref<!tpu.dma_semaphore, #tpu.memory_space<semaphore_mem>>
        tpu.enqueue_dma source(%76 : memref<1x256xf32, #tpu.memory_space<any>>) target(%78 : memref<1x256xf32, #tpu.memory_space<vmem>>) target_semaphore(%80 : memref<!tpu.dma_semaphore, #tpu.memory_space<semaphore_mem>>)
        %c6_i32 = arith.constant 6 : i32
        %81 = arith.addi %26, %c6_i32 : i32
        %82 = arith.addi %24, %81 : i32
        %83 = arith.index_cast %82 : i32 to index
        %84 = memref.load %arg2[%83] : memref<96xi32, #tpu.memory_space<smem>>
        %c0_i32_33 = arith.constant 0 : i32
        %85 = tpu.memref_slice %arg3[%84, %c0_i32_33] : memref<30522x256xf32, #tpu.memory_space<any>> -> memref<1x256xf32, #tpu.memory_space<any>>
        %c0_i32_34 = arith.constant 0 : i32
        %86 = tpu.memref_slice %arg6[%1, %81, %c0_i32_34] : memref<2x16x256xf32, #tpu.memory_space<vmem>> -> memref<1x1x256xf32, #tpu.memory_space<vmem>>
        %87 = tpu.memref_squeeze %86 : memref<1x1x256xf32, #tpu.memory_space<vmem>> -> memref<1x256xf32, #tpu.memory_space<vmem>>
        %88 = tpu.memref_slice %arg7[%1] : memref<2x!tpu.dma_semaphore, #tpu.memory_space<semaphore_mem>> -> memref<1x!tpu.dma_semaphore, #tpu.memory_space<semaphore_mem>>
        %89 = tpu.memref_squeeze %88 : memref<1x!tpu.dma_semaphore, #tpu.memory_space<semaphore_mem>> -> memref<!tpu.dma_semaphore, #tpu.memory_space<semaphore_mem>>
        tpu.enqueue_dma source(%85 : memref<1x256xf32, #tpu.memory_space<any>>) target(%87 : memref<1x256xf32, #tpu.memory_space<vmem>>) target_semaphore(%89 : memref<!tpu.dma_semaphore, #tpu.memory_space<semaphore_mem>>)
        %c7_i32 = arith.constant 7 : i32
        %90 = arith.addi %26, %c7_i32 : i32
        %91 = arith.addi %24, %90 : i32
        %92 = arith.index_cast %91 : i32 to index
        %93 = memref.load %arg2[%92] : memref<96xi32, #tpu.memory_space<smem>>
        %c0_i32_35 = arith.constant 0 : i32
        %94 = tpu.memref_slice %arg3[%93, %c0_i32_35] : memref<30522x256xf32, #tpu.memory_space<any>> -> memref<1x256xf32, #tpu.memory_space<any>>
        %c0_i32_36 = arith.constant 0 : i32
        %95 = tpu.memref_slice %arg6[%1, %90, %c0_i32_36] : memref<2x16x256xf32, #tpu.memory_space<vmem>> -> memref<1x1x256xf32, #tpu.memory_space<vmem>>
        %96 = tpu.memref_squeeze %95 : memref<1x1x256xf32, #tpu.memory_space<vmem>> -> memref<1x256xf32, #tpu.memory_space<vmem>>
        %97 = tpu.memref_slice %arg7[%1] : memref<2x!tpu.dma_semaphore, #tpu.memory_space<semaphore_mem>> -> memref<1x!tpu.dma_semaphore, #tpu.memory_space<semaphore_mem>>
        %98 = tpu.memref_squeeze %97 : memref<1x!tpu.dma_semaphore, #tpu.memory_space<semaphore_mem>> -> memref<!tpu.dma_semaphore, #tpu.memory_space<semaphore_mem>>
        tpu.enqueue_dma source(%94 : memref<1x256xf32, #tpu.memory_space<any>>) target(%96 : memref<1x256xf32, #tpu.memory_space<vmem>>) target_semaphore(%98 : memref<!tpu.dma_semaphore, #tpu.memory_space<semaphore_mem>>)
      }
      %c2_i32_16 = arith.constant 2 : i32
    } else {
    }
    %c0_i32_3 = arith.constant 0 : i32
    %c2_i32_4 = arith.constant 2 : i32
    %9 = arith.addi %c0_i32_3, %c2_i32_4 : i32
    %c1_i32_5 = arith.constant 1 : i32
    scf.for %arg8 = %c0_i32_3 to %9 step %c1_i32_5  : i32 {
      %c0_i32_11 = arith.constant 0 : i32
      %c0_i32_12 = arith.constant 0 : i32
      %21 = tpu.memref_slice %arg3[%c0_i32_11, %c0_i32_12] : memref<30522x256xf32, #tpu.memory_space<any>> -> memref<1x256xf32, #tpu.memory_space<any>>
      %c0_i32_13 = arith.constant 0 : i32
      %c0_i32_14 = arith.constant 0 : i32
      %22 = tpu.memref_slice %arg6[%0, %c0_i32_13, %c0_i32_14] : memref<2x16x256xf32, #tpu.memory_space<vmem>> -> memref<1x1x256xf32, #tpu.memory_space<vmem>>
      %23 = tpu.memref_squeeze %22 : memref<1x1x256xf32, #tpu.memory_space<vmem>> -> memref<1x256xf32, #tpu.memory_space<vmem>>
      %24 = tpu.memref_slice %arg7[%0] : memref<2x!tpu.dma_semaphore, #tpu.memory_space<semaphore_mem>> -> memref<1x!tpu.dma_semaphore, #tpu.memory_space<semaphore_mem>>
      %25 = tpu.memref_squeeze %24 : memref<1x!tpu.dma_semaphore, #tpu.memory_space<semaphore_mem>> -> memref<!tpu.dma_semaphore, #tpu.memory_space<semaphore_mem>>
      tpu.wait_dma2 semaphore(%25 : memref<!tpu.dma_semaphore, #tpu.memory_space<semaphore_mem>>) src(%21 : memref<1x256xf32, #tpu.memory_space<any>>) dst(%23 : memref<1x256xf32, #tpu.memory_space<vmem>>)
      %c0_i32_15 = arith.constant 0 : i32
      %c0_i32_16 = arith.constant 0 : i32
      %26 = tpu.memref_slice %arg3[%c0_i32_15, %c0_i32_16] : memref<30522x256xf32, #tpu.memory_space<any>> -> memref<1x256xf32, #tpu.memory_space<any>>
      %c0_i32_17 = arith.constant 0 : i32
      %c0_i32_18 = arith.constant 0 : i32
      %27 = tpu.memref_slice %arg6[%0, %c0_i32_17, %c0_i32_18] : memref<2x16x256xf32, #tpu.memory_space<vmem>> -> memref<1x1x256xf32, #tpu.memory_space<vmem>>
      %28 = tpu.memref_squeeze %27 : memref<1x1x256xf32, #tpu.memory_space<vmem>> -> memref<1x256xf32, #tpu.memory_space<vmem>>
      %29 = tpu.memref_slice %arg7[%0] : memref<2x!tpu.dma_semaphore, #tpu.memory_space<semaphore_mem>> -> memref<1x!tpu.dma_semaphore, #tpu.memory_space<semaphore_mem>>
      %30 = tpu.memref_squeeze %29 : memref<1x!tpu.dma_semaphore, #tpu.memory_space<semaphore_mem>> -> memref<!tpu.dma_semaphore, #tpu.memory_space<semaphore_mem>>
      tpu.wait_dma2 semaphore(%30 : memref<!tpu.dma_semaphore, #tpu.memory_space<semaphore_mem>>) src(%26 : memref<1x256xf32, #tpu.memory_space<any>>) dst(%28 : memref<1x256xf32, #tpu.memory_space<vmem>>)
      %c0_i32_19 = arith.constant 0 : i32
      %c0_i32_20 = arith.constant 0 : i32
      %31 = tpu.memref_slice %arg3[%c0_i32_19, %c0_i32_20] : memref<30522x256xf32, #tpu.memory_space<any>> -> memref<1x256xf32, #tpu.memory_space<any>>
      %c0_i32_21 = arith.constant 0 : i32
      %c0_i32_22 = arith.constant 0 : i32
      %32 = tpu.memref_slice %arg6[%0, %c0_i32_21, %c0_i32_22] : memref<2x16x256xf32, #tpu.memory_space<vmem>> -> memref<1x1x256xf32, #tpu.memory_space<vmem>>
      %33 = tpu.memref_squeeze %32 : memref<1x1x256xf32, #tpu.memory_space<vmem>> -> memref<1x256xf32, #tpu.memory_space<vmem>>
      %34 = tpu.memref_slice %arg7[%0] : memref<2x!tpu.dma_semaphore, #tpu.memory_space<semaphore_mem>> -> memref<1x!tpu.dma_semaphore, #tpu.memory_space<semaphore_mem>>
      %35 = tpu.memref_squeeze %34 : memref<1x!tpu.dma_semaphore, #tpu.memory_space<semaphore_mem>> -> memref<!tpu.dma_semaphore, #tpu.memory_space<semaphore_mem>>
      tpu.wait_dma2 semaphore(%35 : memref<!tpu.dma_semaphore, #tpu.memory_space<semaphore_mem>>) src(%31 : memref<1x256xf32, #tpu.memory_space<any>>) dst(%33 : memref<1x256xf32, #tpu.memory_space<vmem>>)
      %c0_i32_23 = arith.constant 0 : i32
      %c0_i32_24 = arith.constant 0 : i32
      %36 = tpu.memref_slice %arg3[%c0_i32_23, %c0_i32_24] : memref<30522x256xf32, #tpu.memory_space<any>> -> memref<1x256xf32, #tpu.memory_space<any>>
      %c0_i32_25 = arith.constant 0 : i32
      %c0_i32_26 = arith.constant 0 : i32
      %37 = tpu.memref_slice %arg6[%0, %c0_i32_25, %c0_i32_26] : memref<2x16x256xf32, #tpu.memory_space<vmem>> -> memref<1x1x256xf32, #tpu.memory_space<vmem>>
      %38 = tpu.memref_squeeze %37 : memref<1x1x256xf32, #tpu.memory_space<vmem>> -> memref<1x256xf32, #tpu.memory_space<vmem>>
      %39 = tpu.memref_slice %arg7[%0] : memref<2x!tpu.dma_semaphore, #tpu.memory_space<semaphore_mem>> -> memref<1x!tpu.dma_semaphore, #tpu.memory_space<semaphore_mem>>
      %40 = tpu.memref_squeeze %39 : memref<1x!tpu.dma_semaphore, #tpu.memory_space<semaphore_mem>> -> memref<!tpu.dma_semaphore, #tpu.memory_space<semaphore_mem>>
      tpu.wait_dma2 semaphore(%40 : memref<!tpu.dma_semaphore, #tpu.memory_space<semaphore_mem>>) src(%36 : memref<1x256xf32, #tpu.memory_space<any>>) dst(%38 : memref<1x256xf32, #tpu.memory_space<vmem>>)
      %c0_i32_27 = arith.constant 0 : i32
      %c0_i32_28 = arith.constant 0 : i32
      %41 = tpu.memref_slice %arg3[%c0_i32_27, %c0_i32_28] : memref<30522x256xf32, #tpu.memory_space<any>> -> memref<1x256xf32, #tpu.memory_space<any>>
      %c0_i32_29 = arith.constant 0 : i32
      %c0_i32_30 = arith.constant 0 : i32
      %42 = tpu.memref_slice %arg6[%0, %c0_i32_29, %c0_i32_30] : memref<2x16x256xf32, #tpu.memory_space<vmem>> -> memref<1x1x256xf32, #tpu.memory_space<vmem>>
      %43 = tpu.memref_squeeze %42 : memref<1x1x256xf32, #tpu.memory_space<vmem>> -> memref<1x256xf32, #tpu.memory_space<vmem>>
      %44 = tpu.memref_slice %arg7[%0] : memref<2x!tpu.dma_semaphore, #tpu.memory_space<semaphore_mem>> -> memref<1x!tpu.dma_semaphore, #tpu.memory_space<semaphore_mem>>
      %45 = tpu.memref_squeeze %44 : memref<1x!tpu.dma_semaphore, #tpu.memory_space<semaphore_mem>> -> memref<!tpu.dma_semaphore, #tpu.memory_space<semaphore_mem>>
      tpu.wait_dma2 semaphore(%45 : memref<!tpu.dma_semaphore, #tpu.memory_space<semaphore_mem>>) src(%41 : memref<1x256xf32, #tpu.memory_space<any>>) dst(%43 : memref<1x256xf32, #tpu.memory_space<vmem>>)
      %c0_i32_31 = arith.constant 0 : i32
      %c0_i32_32 = arith.constant 0 : i32
      %46 = tpu.memref_slice %arg3[%c0_i32_31, %c0_i32_32] : memref<30522x256xf32, #tpu.memory_space<any>> -> memref<1x256xf32, #tpu.memory_space<any>>
      %c0_i32_33 = arith.constant 0 : i32
      %c0_i32_34 = arith.constant 0 : i32
      %47 = tpu.memref_slice %arg6[%0, %c0_i32_33, %c0_i32_34] : memref<2x16x256xf32, #tpu.memory_space<vmem>> -> memref<1x1x256xf32, #tpu.memory_space<vmem>>
      %48 = tpu.memref_squeeze %47 : memref<1x1x256xf32, #tpu.memory_space<vmem>> -> memref<1x256xf32, #tpu.memory_space<vmem>>
      %49 = tpu.memref_slice %arg7[%0] : memref<2x!tpu.dma_semaphore, #tpu.memory_space<semaphore_mem>> -> memref<1x!tpu.dma_semaphore, #tpu.memory_space<semaphore_mem>>
      %50 = tpu.memref_squeeze %49 : memref<1x!tpu.dma_semaphore, #tpu.memory_space<semaphore_mem>> -> memref<!tpu.dma_semaphore, #tpu.memory_space<semaphore_mem>>
      tpu.wait_dma2 semaphore(%50 : memref<!tpu.dma_semaphore, #tpu.memory_space<semaphore_mem>>) src(%46 : memref<1x256xf32, #tpu.memory_space<any>>) dst(%48 : memref<1x256xf32, #tpu.memory_space<vmem>>)
      %c0_i32_35 = arith.constant 0 : i32
      %c0_i32_36 = arith.constant 0 : i32
      %51 = tpu.memref_slice %arg3[%c0_i32_35, %c0_i32_36] : memref<30522x256xf32, #tpu.memory_space<any>> -> memref<1x256xf32, #tpu.memory_space<any>>
      %c0_i32_37 = arith.constant 0 : i32
      %c0_i32_38 = arith.constant 0 : i32
      %52 = tpu.memref_slice %arg6[%0, %c0_i32_37, %c0_i32_38] : memref<2x16x256xf32, #tpu.memory_space<vmem>> -> memref<1x1x256xf32, #tpu.memory_space<vmem>>
      %53 = tpu.memref_squeeze %52 : memref<1x1x256xf32, #tpu.memory_space<vmem>> -> memref<1x256xf32, #tpu.memory_space<vmem>>
      %54 = tpu.memref_slice %arg7[%0] : memref<2x!tpu.dma_semaphore, #tpu.memory_space<semaphore_mem>> -> memref<1x!tpu.dma_semaphore, #tpu.memory_space<semaphore_mem>>
      %55 = tpu.memref_squeeze %54 : memref<1x!tpu.dma_semaphore, #tpu.memory_space<semaphore_mem>> -> memref<!tpu.dma_semaphore, #tpu.memory_space<semaphore_mem>>
      tpu.wait_dma2 semaphore(%55 : memref<!tpu.dma_semaphore, #tpu.memory_space<semaphore_mem>>) src(%51 : memref<1x256xf32, #tpu.memory_space<any>>) dst(%53 : memref<1x256xf32, #tpu.memory_space<vmem>>)
      %c0_i32_39 = arith.constant 0 : i32
      %c0_i32_40 = arith.constant 0 : i32
      %56 = tpu.memref_slice %arg3[%c0_i32_39, %c0_i32_40] : memref<30522x256xf32, #tpu.memory_space<any>> -> memref<1x256xf32, #tpu.memory_space<any>>
      %c0_i32_41 = arith.constant 0 : i32
      %c0_i32_42 = arith.constant 0 : i32
      %57 = tpu.memref_slice %arg6[%0, %c0_i32_41, %c0_i32_42] : memref<2x16x256xf32, #tpu.memory_space<vmem>> -> memref<1x1x256xf32, #tpu.memory_space<vmem>>
      %58 = tpu.memref_squeeze %57 : memref<1x1x256xf32, #tpu.memory_space<vmem>> -> memref<1x256xf32, #tpu.memory_space<vmem>>
      %59 = tpu.memref_slice %arg7[%0] : memref<2x!tpu.dma_semaphore, #tpu.memory_space<semaphore_mem>> -> memref<1x!tpu.dma_semaphore, #tpu.memory_space<semaphore_mem>>
      %60 = tpu.memref_squeeze %59 : memref<1x!tpu.dma_semaphore, #tpu.memory_space<semaphore_mem>> -> memref<!tpu.dma_semaphore, #tpu.memory_space<semaphore_mem>>
      tpu.wait_dma2 semaphore(%60 : memref<!tpu.dma_semaphore, #tpu.memory_space<semaphore_mem>>) src(%56 : memref<1x256xf32, #tpu.memory_space<any>>) dst(%58 : memref<1x256xf32, #tpu.memory_space<vmem>>)
    }
    %c16_i32 = arith.constant 16 : i32
    %10 = arith.muli %arg1, %c16_i32 : i32
    %11 = tpu.assume_multiple %10, 16 : i32
    %12 = arith.index_cast %0 : i32 to index
    %c0 = arith.constant 0 : index
    %c0_6 = arith.constant 0 : index
    %13 = vector.load %arg6[%12, %c0, %c0_6] : memref<2x16x256xf32, #tpu.memory_space<vmem>>, vector<1x16x256xf32>
    %14 = vector.shape_cast %13 : vector<1x16x256xf32> to vector<16x256xf32>
    %15 = arith.index_cast %11 : i32 to index
    %c0_7 = arith.constant 0 : index
    %16 = vector.load %arg4[%15, %c0_7] : memref<48x256xf32, #tpu.memory_space<vmem>>, vector<16x256xf32>
    %17 = arith.addf %14, %16 : vector<16x256xf32>
    %c0_8 = arith.constant 0 : index
    %c0_9 = arith.constant 0 : index
    %c0_10 = arith.constant 0 : index
    %18 = vector.load %arg5[%c0_8, %c0_9, %c0_10] : memref<1x16x256xf32, #tpu.memory_space<vmem>>, vector<1x16x256xf32>
    %19 = vector.shape_cast %18 : vector<1x16x256xf32> to vector<16x256xf32>
    %20 = vector.shape_cast %17 : vector<16x256xf32> to vector<1x16x256xf32>
    tpu.vector_store %arg5[%c0_8, %c0_9, %c0_10], %20 {strides = array<i32>} : memref<1x16x256xf32, #tpu.memory_space<vmem>>, vector<1x16x256xf32>,
    return
  }
  func.func @transform_1(%arg0: i32, %arg1: i32, %arg2: memref<96xi32, #tpu.memory_space<smem>>) -> (i32, i32) {
    %c0_i32 = arith.constant 0 : i32
    %c0_i32_0 = arith.constant 0 : i32
    %c0_i32_1 = arith.constant 0 : i32
    return %c0_i32, %c0_i32_0 : i32, i32
  }
  func.func @transform_2(%arg0: i32, %arg1: i32, %arg2: memref<96xi32, #tpu.memory_space<smem>>) -> (i32, i32, i32) {
    %c0_i32 = arith.constant 0 : i32
    %c0_i32_0 = arith.constant 0 : i32
    return %arg0, %arg1, %c0_i32 : i32, i32, i32
  }
}

</mosaic_0001>

<bundles_post_ra>
// kernel: embedding_forward.1
= control target key start
LH: loop header
LB: loop body
LE: loop exit
PB: predicated region body
PF: predicated region fallthrough
CT: control target
= control target key end

     0   :  { %s1946_s0 = inlined_call_operand.vmem [shape: s32[96], index: 0, kind: input, shape index: {}]   ;;  %s1947_s1 = inlined_call_operand.hbm [shape: f32[30522,256], index: 1, kind: input, shape index: {}]   ;;  %s1948_s2 = inlined_call_operand.vmem [shape: f32[48,256], index: 2, kind: input, shape index: {}]   ;;  %s1949_s3 = inlined_call_operand.vmem [shape: f32[2,48,256], index: 3, kind: output, shape index: {}]  }
   0x1   :  { %1961 = sst [smem:[#allocation35_spill]] %s1948_s2  ;;  %s8_s14 = sshll.u32 %s1946_s0, 4  ;;  %s9_s14 = int_to_ptr.vmem [resolvable:$true] %s8_s14 }
   0x2   :  { %1962 = sst [smem:[#allocation36_spill]] %s1949_s3  ;;  %s941_s15 = scalar_lea.vmem %s9_s14, 16 }
   0x3   :  { %p942_p0 = scmp.ne.s32.totalorder %s9_s14, %s941_s15  ;;  %p946_p1 = scmp.lt.s32.totalorder %s9_s14, %s9_s14 }
   0x4   :  { %p947_p2 = scmp.lt.s32.totalorder %s941_s15, %s941_s15 }
   0x6   :  { %p948_p3 = por %p947_p2, %p946_p1 }
   0x8   :  { %p949_p4 = pnand %p948_p3, %p942_p0 }
   0xa   :  { %952 = shalt.err (!%p949_p4)  }
   0xb   :  { %s1405_s16 = smov [#allocation5]  }
   0xc   :  { %11 = dma.vmem_to_smem %s9_s14, 16, %s1405_s16, [#allocation4] }
   0xd   :  { %1369 = dma.done.wait [#allocation4], 16 }
   0xe   :  { %1370 = vsyncadd [#allocation4], 4294967280 }
   0xf   :  { %13 = sfence }
  0x10   :  { %s1435_s17 = smov 0   ;;  %s1437_s18 = smov 0  }
  0x11   :  { %s1439_s19 = smov 0   ;;  %s1441_s0 = smov 0  }
  0x12   :  { %s1443_s20 = smov 0  }
  0x13 LB: > { %1963 = sst [smem:[#allocation24_spill]] %s1375_s17  ;;  %s28_s21 = sadd.s32 1, %s1383_s19  ;;  %s1391_s20 = sphi %s1443_s20, %s19_s20   ;;  %s1387_s0 = sphi %s1441_s0, %s1992_s0   ;;  %s1383_s19 = sphi %s1439_s19, %s1991_s19   ;;  %s1379_s18 = sphi %s1437_s18, %s1990_s18   ;;  %s1375_s17 = sphi %s1435_s17, %s1989_s17  }
  0x14   : > { %1964 = sst [smem:[#allocation25_spill]] %s1379_s18  ;;  %s31_s22 = sadd.s32 1, %s1387_s0 }
  0x15   : > { %1965 = sst [smem:[#allocation26_spill]] %s1383_s19  ;;  %p29_p5 = scmp.ge.s32.totalorder %s28_s21, 3 }
  0x16   : > { %1966 = sst [smem:[#allocation27_spill]] %s1387_s0  ;;  %p797_p6 = scmp.ge.s32.totalorder %s1391_s20, 1 }
  0x17   : > { %1967 = sst [smem:[#allocation28_spill]] %s1391_s20  ;;  %p99_p7 = scmp.lt.s32.totalorder %s1391_s20, 7 }
  0x18   : > { %s1994_s21 = smov (%p29_p5, %s28_s21), 0  ;;  %s1996_s22 = smov (!%p29_p5, %s31_s22), %s1387_s0 }
  0x19   : > { %1968 = sst [smem:[#allocation29_spill]] %s1994_s21  ;;  %p100_p8 = pnand %p797_p6, %p99_p7 }
  0x1a   : > { %p33_p9 = scmp.ge.s32.totalorder %s1996_s22, 2 }
  0x1b   : > { %103 = sbr.rel (%p100_p8) target bundleno = 589 (0x24d), region = 24 }
  0x1c   : > { %s1998_s22 = smov (%p33_p9, %s1996_s22), 0 }
  0x1d   : > { %1969 = sst [smem:[#allocation30_spill]] %s1998_s22 }
  0x22   : > { %s798_s23 = sshll.u32 %s1375_s17, 1  ;;  %p120_p10 = scmp.lt.s32.totalorder %s1379_s18, 1 }
  0x23   : > { %p122_p11 = scmp.lt.s32.totalorder %s798_s23, 5  ;;  %p130_p12 = scmp.lt.s32.totalorder %s1375_s17, 0 }
  0x24   : > { %s121_s24 = scalar_select %p120_p10, %s1379_s18, 1 }
  0x25   : > { %s2000_s23 = smov (!%p122_p11, %s798_s23), 5  ;;  %s131_s26 = ssub.s32 0, %s1375_s17 }
  0x26   : > { %s871_s25 = smul.u32 12, %s121_s24  ;;  %s799_s27 = sshll.u32 %s2000_s23, 1 }
  0x27   : > { %s801_s28 = smin.u32 %s1375_s17, %s131_s26  ;;  %s1970_s3 = sld [smem:[#allocation36_spill]] }
  0x28   : > { %s126_s29 = sadd.s32 %s871_s25, %s799_s27  ;;  %s133_s30 = sand.u32 1, %s801_s28  }
  0x29   : > { %s800_s4 = sshll.u32 %s126_s29, 3  ;;  %s134_s5 = ssub.s32 0, %s133_s30 }
  0x2a   : > { %s2002_s5 = smov (!%p130_p12, %s134_s5), %s133_s30  ;;  %p802_p13 = scmp.ne.s32.totalorder %s1375_s17, 0 }
  0x2b   : > { %1972 = sst [smem:[#allocation32_spill]] %s2002_s5 }
  0x2c   : > { %140 = sbr.rel (%p802_p13) target bundleno = 296 (0x128), region = 28 }
  0x2d   : > { %s1478_s8 = scalar_lea.vmem %s1970_s3, %s800_s4 }
  0x2e   : > { %1971 = sst [smem:[#allocation31_spill]] %s1478_s8 }
  0x33   : > { %s141_s10 = smul.u32 48, %s1379_s18  ;;  %s803_s11 = sshll.u32 %s1375_s17, 4 }
  0x34   : > { %s1488_s13 = smov 0  }
  0x35   : > { %s1486_s12 = sadd.s32 %s803_s11, %s141_s10 }
  0x36 LB: >> { %s1973_s5 = sld [smem:[#allocation32_spill]]  ;;  %1974 = sst [smem:[#allocation33_spill]] %s1395_s13  ;;  %s1395_s13 = sphi %s1488_s13, %s149_s13  }
  0x37   : >> { %s1497_s15 = sshll.u32 %s1395_s13, 3 }
  0x38   : >> { %s151_s16 = sadd.s32 %s1497_s15, %s1486_s12  ;;  %s159_s23 = sshrl.u32 %s1497_s15, 3 }
  0x39   : >> { %s152_s24 = sld [smem:[#allocation5 + %s151_s16]]  ;;  %s160_s25 = sand.u32 7, %s1497_s15  }
  0x3a   : >> { %s807_s26 = sshll.u32 %s159_s23, 4  ;;  %s1504_s28 = sadd.s32 1, %s1497_s15 }
  0x3b   : >> { %s162_s27 = sadd.s32 %s807_s26, %s160_s25  ;;  %s173_s30 = sadd.s32 %s1504_s28, %s1486_s12 }
  0x3c   : >> { %s1494_s14 = sshll.u32 %s1973_s5, 5  ;;  %s1509_s4 = sld [smem:[#allocation5 + %s173_s30]] }
  0x3d   : >> { %s164_s29 = sadd.s32 %s1494_s14, %s162_s27  ;;  %s181_s10 = sshrl.u32 %s1504_s28, 3 }
  0x3e   : >> { %s165_s6 = scalar_lea.vmem [#allocation2], %s164_s29  ;;  %s182_s25 = sand.u32 7, %s1504_s28  }
  0x3f   : >> { %s168_s7 = sshll.u32 %s165_s6, 4  ;;  %s153_s11 = sshrl.u32 %s152_s24, 3  ;;  %s1512_s7 = int_to_ptr.vmem [resolvable:$true] %s168_s7 }
  0x40   : >> { %s154_s9 = sand.u32 7, %s152_s24   ;;  %s805_s16 = sshll.u32 %s153_s11, 4 }
  0x41   : >> { %s156_s23 = sadd.s32 %s805_s16, %s154_s9  ;;  %s1515_s3 = sshll.u32 %s181_s10, 4 }
  0x42   : >> { %s806_s26 = sshll.u32 %s156_s23, 4  ;;  %s175_s29 = sshrl.u32 %s1509_s4, 3 }
  0x43   : >> { %s1520_s21 = scalar_lea.hbm %s1947_s1, %s806_s26  ;;  %s1524_s30 = scalar_lea.sflag [#allocation3], %s1973_s5 }
  0x44   : >> { %s953_s24 = scalar_lea.hbm %s1520_s21, 32  ;;  %s1531_s11 = scalar_lea.hbm %s1947_s1, 976896 }
  0x45   : >> { %p954_p0 = scmp.ne.s32.totalorder %s1520_s21, %s953_s24  ;;  %p956_p1 = scmp.lt.u32.totalorder %s1520_s21, %s1947_s1 }
  0x46   : >> { %p957_p2 = scmp.lt.u32.totalorder %s1531_s11, %s953_s24  ;;  %p959_p4 = scmp.lt.u32.totalorder %s953_s24, %s1520_s21 }
  0x48   : >> { %p958_p3 = por %p957_p2, %p956_p1 }
  0x4a   : >> { %p960_p5 = por %p959_p4, %p958_p3 }
  0x4c   : >> { %p961_p6 = pnand %p960_p5, %p954_p0 }
  0x4e   : >> { %964 = shalt.err (!%p961_p6)  }
  0x4f   : >> { %s965_s22 = scalar_lea.vmem %s1512_s7, 32  ;;  %s1406_s23 = smov [#allocation2]  }
  0x50   : >> { %p966_p7 = scmp.ne.s32.totalorder %s1512_s7, %s965_s22  ;;  %s967_s26 = sshll.u32 %s1406_s23, 4  ;;  %s1541_s26 = int_to_ptr.vmem [resolvable:$false] %s967_s26 }
  0x51   : >> { %s1544_s27 = scalar_lea.vmem %s1541_s26, 1024  ;;  %p970_p8 = scmp.lt.s32.totalorder %s1512_s7, %s1541_s26 }
  0x52   : >> { %p971_p9 = scmp.lt.s32.totalorder %s1544_s27, %s965_s22 }
  0x54   : >> { %p972_p10 = por %p971_p9, %p970_p8 }
  0x56   : >> { %p973_p11 = pnand %p972_p10, %p966_p7 }
  0x58   : >> { %976 = shalt.err (!%p973_p11)  }
  0x59   : >> { %s1407_s24 = smov 128   ;;  %s1408_s6 = smov 1  }
  0x5a   : >> { %171 = dma.hbm_to_vmem [thread:$0]  %s1520_s21, 32, %s1512_s7, %s1524_s30, %s1407_s24, %s1407_s24, %s1408_s6 }
  0x5b   : >> { %s176_s9 = sand.u32 7, %s1509_s4   ;;  %s809_s10 = sshll.u32 %s175_s29, 4 }
  0x5c   : >> { %s178_s16 = sadd.s32 %s809_s10, %s176_s9  ;;  %s184_s22 = sadd.s32 %s1515_s3, %s182_s25 }
  0x5d   : >> { %s810_s23 = sshll.u32 %s178_s16, 4  ;;  %s185_s0 = sadd.s32 %s1494_s14, %s184_s22 }
  0x5e   : >> { %s180_s2 = scalar_lea.hbm %s1947_s1, %s810_s23  ;;  %s186_s8 = scalar_lea.vmem [#allocation2], %s185_s0 }
  0x5f   : >> { %s188_s5 = sshll.u32 %s186_s8, 4  ;;  %s192_s18 = sadd.s32 2, %s1497_s15  ;;  %s189_s5 = int_to_ptr.vmem [resolvable:$true] %s188_s5 }
  0x60   : >> { %s193_s17 = sadd.s32 %s192_s18, %s1486_s12  ;;  %s977_s13 = scalar_lea.hbm %s180_s2, 32 }
  0x61   : >> { %p978_p12 = scmp.ne.s32.totalorder %s180_s2, %s977_s13  ;;  %p980_p13 = scmp.lt.u32.totalorder %s180_s2, %s1947_s1 }
  0x62   : >> { %p981_p0 = scmp.lt.u32.totalorder %s1531_s11, %s977_s13  ;;  %p983_p2 = scmp.lt.u32.totalorder %s977_s13, %s180_s2 }
  0x64   : >> { %p982_p1 = por %p981_p0, %p980_p13 }
  0x66   : >> { %p984_p3 = por %p983_p2, %p982_p1 }
  0x68   : >> { %p985_p4 = pnand %p984_p3, %p978_p12 }
  0x6a   : >> { %988 = shalt.err (!%p985_p4)  }
  0x6b   : >> { %s989_s3 = scalar_lea.vmem %s189_s5, 32  ;;  %p994_p6 = scmp.lt.s32.totalorder %s189_s5, %s1541_s26 }
  0x6c   : >> { %p990_p5 = scmp.ne.s32.totalorder %s189_s5, %s989_s3  ;;  %p995_p7 = scmp.lt.s32.totalorder %s1544_s27, %s989_s3 }
  0x6e   : >> { %p996_p8 = por %p995_p7, %p994_p6 }
  0x70   : >> { %p997_p9 = pnand %p996_p8, %p990_p5 }
  0x72   : >> { %1000 = shalt.err (!%p997_p9)  }
  0x73   : >> { %191 = dma.hbm_to_vmem [thread:$0]  %s180_s2, 32, %s189_s5, %s1524_s30, %s1407_s24, %s1407_s24, %s1408_s6 }
  0x74   : >> { %s194_s19 = sld [smem:[#allocation5 + %s193_s17]]  ;;  %s201_s0 = sshrl.u32 %s192_s18, 3 }
  0x75   : >> { %s202_s20 = sand.u32 7, %s192_s18   ;;  %s814_s8 = sshll.u32 %s201_s0, 4 }
  0x76   : >> { %s204_s13 = sadd.s32 %s814_s8, %s202_s20  ;;  %s1578_s28 = sadd.s32 3, %s1497_s15 }
  0x77   : >> { %s205_s4 = sadd.s32 %s1494_s14, %s204_s13  ;;  %s213_s25 = sadd.s32 %s1578_s28, %s1486_s12 }
  0x78   : >> { %s1583_s29 = sld [smem:[#allocation5 + %s213_s25]]  ;;  %s206_s9 = scalar_lea.vmem [#allocation2], %s205_s4 }
  0x79   : >> { %s208_s10 = sshll.u32 %s206_s9, 4  ;;  %s221_s16 = sshrl.u32 %s1578_s28, 3  ;;  %s209_s10 = int_to_ptr.vmem [resolvable:$true] %s208_s10 }
  0x7a   : >> { %s195_s2 = sshrl.u32 %s194_s19, 3  ;;  %s196_s17 = sand.u32 7, %s194_s19  }
  0x7b   : >> { %s812_s5 = sshll.u32 %s195_s2, 4  ;;  %s222_s22 = sand.u32 7, %s1578_s28  }
  0x7c   : >> { %s198_s18 = sadd.s32 %s812_s5, %s196_s17  ;;  %s817_s21 = sshll.u32 %s221_s16, 4 }
  0x7d   : >> { %s813_s23 = sshll.u32 %s198_s18, 4 }
  0x7e   : >> { %s200_s0 = scalar_lea.hbm %s1947_s1, %s813_s23  ;;  %s215_s20 = sshrl.u32 %s1583_s29, 3 }
  0x7f   : >> { %s1001_s8 = scalar_lea.hbm %s200_s0, 32  ;;  %p1004_p11 = scmp.lt.u32.totalorder %s200_s0, %s1947_s1 }
  0x80   : >> { %p1002_p10 = scmp.ne.s32.totalorder %s200_s0, %s1001_s8  ;;  %p1005_p12 = scmp.lt.u32.totalorder %s1531_s11, %s1001_s8 }
  0x81   : >> { %p1007_p0 = scmp.lt.u32.totalorder %s1001_s8, %s200_s0 }
  0x82   : >> { %p1006_p13 = por %p1005_p12, %p1004_p11 }
  0x84   : >> { %p1008_p1 = por %p1007_p0, %p1006_p13 }
  0x86   : >> { %p1009_p2 = pnand %p1008_p1, %p1002_p10 }
  0x88   : >> { %1012 = shalt.err (!%p1009_p2)  }
  0x89   : >> { %s1013_s19 = scalar_lea.vmem %s209_s10, 32  ;;  %p1018_p4 = scmp.lt.s32.totalorder %s209_s10, %s1541_s26 }
  0x8a   : >> { %p1014_p3 = scmp.ne.s32.totalorder %s209_s10, %s1013_s19  ;;  %p1019_p5 = scmp.lt.s32.totalorder %s1544_s27, %s1013_s19 }
  0x8c   : >> { %p1020_p6 = por %p1019_p5, %p1018_p4 }
  0x8e   : >> { %p1021_p7 = pnand %p1020_p6, %p1014_p3 }
  0x90   : >> { %1024 = shalt.err (!%p1021_p7)  }
  0x91   : >> { %211 = dma.hbm_to_vmem [thread:$0]  %s200_s0, 32, %s209_s10, %s1524_s30, %s1407_s24, %s1407_s24, %s1408_s6 }
  0x92   : >> { %s216_s28 = sand.u32 7, %s1583_s29   ;;  %s815_s25 = sshll.u32 %s215_s20, 4 }
  0x93   : >> { %s218_s9 = sadd.s32 %s815_s25, %s216_s28  ;;  %s224_s16 = sadd.s32 %s817_s21, %s222_s22 }
  0x94   : >> { %s816_s2 = sshll.u32 %s218_s9, 4  ;;  %s225_s17 = sadd.s32 %s1494_s14, %s224_s16 }
  0x95   : >> { %s220_s23 = scalar_lea.hbm %s1947_s1, %s816_s2  ;;  %s226_s7 = scalar_lea.vmem [#allocation2], %s225_s17 }
  0x96   : >> { %s228_s3 = sshll.u32 %s226_s7, 4  ;;  %s232_s8 = sadd.s32 4, %s1497_s15  ;;  %s229_s3 = int_to_ptr.vmem [resolvable:$true] %s228_s3 }
  0x97   : >> { %s233_s13 = sadd.s32 %s232_s8, %s1486_s12  ;;  %s1025_s4 = scalar_lea.hbm %s220_s23, 32 }
  0x98   : >> { %p1026_p8 = scmp.ne.s32.totalorder %s220_s23, %s1025_s4  ;;  %p1028_p9 = scmp.lt.u32.totalorder %s220_s23, %s1947_s1 }
  0x99   : >> { %p1029_p10 = scmp.lt.u32.totalorder %s1531_s11, %s1025_s4  ;;  %p1031_p12 = scmp.lt.u32.totalorder %s1025_s4, %s220_s23 }
  0x9b   : >> { %p1030_p11 = por %p1029_p10, %p1028_p9 }
  0x9d   : >> { %p1032_p13 = por %p1031_p12, %p1030_p11 }
  0x9f   : >> { %p1033_p0 = pnand %p1032_p13, %p1026_p8 }
  0xa1   : >> { %1036 = shalt.err (!%p1033_p0)  }
  0xa2   : >> { %s1037_s29 = scalar_lea.vmem %s229_s3, 32  ;;  %p1042_p2 = scmp.lt.s32.totalorder %s229_s3, %s1541_s26 }
  0xa3   : >> { %p1038_p1 = scmp.ne.s32.totalorder %s229_s3, %s1037_s29  ;;  %p1043_p3 = scmp.lt.s32.totalorder %s1544_s27, %s1037_s29 }
  0xa5   : >> { %p1044_p4 = por %p1043_p3, %p1042_p2 }
  0xa7   : >> { %p1045_p5 = pnand %p1044_p4, %p1038_p1 }
  0xa9   : >> { %1048 = shalt.err (!%p1045_p5)  }
  0xaa   : >> { %231 = dma.hbm_to_vmem [thread:$0]  %s220_s23, 32, %s229_s3, %s1524_s30, %s1407_s24, %s1407_s24, %s1408_s6 }
  0xab   : >> { %s234_s22 = sld [smem:[#allocation5 + %s233_s13]]  ;;  %s241_s21 = sshrl.u32 %s232_s8, 3 }
  0xac   : >> { %s242_s0 = sand.u32 7, %s232_s8   ;;  %s820_s20 = sshll.u32 %s241_s21, 4 }
  0xad   : >> { %s244_s28 = sadd.s32 %s820_s20, %s242_s0  ;;  %s1619_s25 = sadd.s32 5, %s1497_s15 }
  0xae   : >> { %s245_s9 = sadd.s32 %s1494_s14, %s244_s28  ;;  %s253_s16 = sadd.s32 %s1619_s25, %s1486_s12 }
  0xaf   : >> { %s1624_s2 = sld [smem:[#allocation5 + %s253_s16]]  ;;  %s246_s17 = scalar_lea.vmem [#allocation2], %s245_s9 }
  0xb0   : >> { %s248_s5 = sshll.u32 %s246_s17, 4  ;;  %s261_s18 = sshrl.u32 %s1619_s25, 3  ;;  %s249_s5 = int_to_ptr.vmem [resolvable:$true] %s248_s5 }
  0xb1   : >> { %s235_s23 = sshrl.u32 %s234_s22, 3  ;;  %s236_s7 = sand.u32 7, %s234_s22  }
  0xb2   : >> { %s818_s3 = sshll.u32 %s235_s23, 4  ;;  %s262_s13 = sand.u32 7, %s1619_s25  }
  0xb3   : >> { %s238_s8 = sadd.s32 %s818_s3, %s236_s7  ;;  %s823_s19 = sshll.u32 %s261_s18, 4 }
  0xb4   : >> { %s819_s4 = sshll.u32 %s238_s8, 4 }
  0xb5   : >> { %s240_s21 = scalar_lea.hbm %s1947_s1, %s819_s4  ;;  %s255_s0 = sshrl.u32 %s1624_s2, 3 }
  0xb6   : >> { %s1049_s20 = scalar_lea.hbm %s240_s21, 32  ;;  %p1052_p7 = scmp.lt.u32.totalorder %s240_s21, %s1947_s1 }
  0xb7   : >> { %p1050_p6 = scmp.ne.s32.totalorder %s240_s21, %s1049_s20  ;;  %p1053_p8 = scmp.lt.u32.totalorder %s1531_s11, %s1049_s20 }
  0xb8   : >> { %p1055_p10 = scmp.lt.u32.totalorder %s1049_s20, %s240_s21 }
  0xb9   : >> { %p1054_p9 = por %p1053_p8, %p1052_p7 }
  0xbb   : >> { %p1056_p11 = por %p1055_p10, %p1054_p9 }
  0xbd   : >> { %p1057_p12 = pnand %p1056_p11, %p1050_p6 }
  0xbf   : >> { %1060 = shalt.err (!%p1057_p12)  }
  0xc0   : >> { %s1061_s22 = scalar_lea.vmem %s249_s5, 32  ;;  %p1066_p0 = scmp.lt.s32.totalorder %s249_s5, %s1541_s26 }
  0xc1   : >> { %p1062_p13 = scmp.ne.s32.totalorder %s249_s5, %s1061_s22  ;;  %p1067_p1 = scmp.lt.s32.totalorder %s1544_s27, %s1061_s22 }
  0xc3   : >> { %p1068_p2 = por %p1067_p1, %p1066_p0 }
  0xc5   : >> { %p1069_p3 = pnand %p1068_p2, %p1062_p13 }
  0xc7   : >> { %1072 = shalt.err (!%p1069_p3)  }
  0xc8   : >> { %251 = dma.hbm_to_vmem [thread:$0]  %s240_s21, 32, %s249_s5, %s1524_s30, %s1407_s24, %s1407_s24, %s1408_s6 }
  0xc9   : >> { %s256_s25 = sand.u32 7, %s1624_s2   ;;  %s821_s16 = sshll.u32 %s255_s0, 4 }
  0xca   : >> { %s258_s17 = sadd.s32 %s821_s16, %s256_s25  ;;  %s264_s18 = sadd.s32 %s823_s19, %s262_s13 }
  0xcb   : >> { %s822_s23 = sshll.u32 %s258_s17, 4  ;;  %s265_s7 = sadd.s32 %s1494_s14, %s264_s18 }
  0xcc   : >> { %s260_s4 = scalar_lea.hbm %s1947_s1, %s822_s23  ;;  %s266_s10 = scalar_lea.vmem [#allocation2], %s265_s7 }
  0xcd   : >> { %s268_s29 = sshll.u32 %s266_s10, 4  ;;  %s272_s20 = sadd.s32 6, %s1497_s15  ;;  %s269_s29 = int_to_ptr.vmem [resolvable:$true] %s268_s29 }
  0xce   : >> { %s273_s28 = sadd.s32 %s272_s20, %s1486_s12  ;;  %s1073_s9 = scalar_lea.hbm %s260_s4, 32 }
  0xcf   : >> { %p1074_p4 = scmp.ne.s32.totalorder %s260_s4, %s1073_s9  ;;  %p1076_p5 = scmp.lt.u32.totalorder %s260_s4, %s1947_s1 }
  0xd0   : >> { %p1077_p6 = scmp.lt.u32.totalorder %s1531_s11, %s1073_s9  ;;  %p1079_p8 = scmp.lt.u32.totalorder %s1073_s9, %s260_s4 }
  0xd2   : >> { %p1078_p7 = por %p1077_p6, %p1076_p5 }
  0xd4   : >> { %p1080_p9 = por %p1079_p8, %p1078_p7 }
  0xd6   : >> { %p1081_p10 = pnand %p1080_p9, %p1074_p4 }
  0xd8   : >> { %1084 = shalt.err (!%p1081_p10)  }
  0xd9   : >> { %s1085_s2 = scalar_lea.vmem %s269_s29, 32  ;;  %p1090_p12 = scmp.lt.s32.totalorder %s269_s29, %s1541_s26 }
  0xda   : >> { %p1086_p11 = scmp.ne.s32.totalorder %s269_s29, %s1085_s2  ;;  %p1091_p13 = scmp.lt.s32.totalorder %s1544_s27, %s1085_s2 }
  0xdc   : >> { %p1092_p0 = por %p1091_p13, %p1090_p12 }
  0xde   : >> { %p1093_p1 = pnand %p1092_p0, %p1086_p11 }
  0xe0   : >> { %1096 = shalt.err (!%p1093_p1)  }
  0xe1   : >> { %271 = dma.hbm_to_vmem [thread:$0]  %s260_s4, 32, %s269_s29, %s1524_s30, %s1407_s24, %s1407_s24, %s1408_s6 }
  0xe2   : >> { %s274_s13 = sld [smem:[#allocation5 + %s273_s28]]  ;;  %s281_s19 = sshrl.u32 %s272_s20, 3 }
  0xe3   : >> { %s282_s21 = sand.u32 7, %s272_s20   ;;  %s826_s0 = sshll.u32 %s281_s19, 4 }
  0xe4   : >> { %s284_s25 = sadd.s32 %s826_s0, %s282_s21  ;;  %s1660_s16 = sadd.s32 7, %s1497_s15 }
  0xe5   : >> { %s285_s17 = sadd.s32 %s1494_s14, %s284_s25  ;;  %s293_s18 = sadd.s32 %s1660_s16, %s1486_s12 }
  0xe6   : >> { %s1665_s23 = sld [smem:[#allocation5 + %s293_s18]]  ;;  %s286_s7 = scalar_lea.vmem [#allocation2], %s285_s17 }
  0xe7   : >> { %s288_s3 = sshll.u32 %s286_s7, 4  ;;  %s301_s8 = sshrl.u32 %s1660_s16, 3  ;;  %s289_s3 = int_to_ptr.vmem [resolvable:$true] %s288_s3 }
  0xe8   : >> { %s275_s4 = sshrl.u32 %s274_s13, 3  ;;  %s276_s10 = sand.u32 7, %s274_s13  }
  0xe9   : >> { %s824_s29 = sshll.u32 %s275_s4, 4  ;;  %s302_s28 = sand.u32 7, %s1660_s16  }
  0xea   : >> { %s278_s20 = sadd.s32 %s824_s29, %s276_s10  ;;  %s829_s9 = sshll.u32 %s301_s8, 4 }
  0xeb   : >> { %s825_s15 = sshll.u32 %s278_s20, 4 }
  0xec   : >> { %s280_s2 = scalar_lea.hbm %s1947_s1, %s825_s15  ;;  %s295_s19 = sshrl.u32 %s1665_s23, 3 }
  0xed   : >> { %s1097_s21 = scalar_lea.hbm %s280_s2, 32  ;;  %p1100_p3 = scmp.lt.u32.totalorder %s280_s2, %s1947_s1 }
  0xee   : >> { %p1098_p2 = scmp.ne.s32.totalorder %s280_s2, %s1097_s21  ;;  %p1101_p4 = scmp.lt.u32.totalorder %s1531_s11, %s1097_s21 }
  0xef   : >> { %p1103_p6 = scmp.lt.u32.totalorder %s1097_s21, %s280_s2 }
  0xf0   : >> { %p1102_p5 = por %p1101_p4, %p1100_p3 }
  0xf2   : >> { %p1104_p7 = por %p1103_p6, %p1102_p5 }
  0xf4   : >> { %p1105_p8 = pnand %p1104_p7, %p1098_p2 }
  0xf6   : >> { %1108 = shalt.err (!%p1105_p8)  }
  0xf7   : >> { %s1109_s13 = scalar_lea.vmem %s289_s3, 32  ;;  %p1114_p10 = scmp.lt.s32.totalorder %s289_s3, %s1541_s26 }
  0xf8   : >> { %p1110_p9 = scmp.ne.s32.totalorder %s289_s3, %s1109_s13  ;;  %p1115_p11 = scmp.lt.s32.totalorder %s1544_s27, %s1109_s13 }
  0xfa   : >> { %p1116_p12 = por %p1115_p11, %p1114_p10 }
  0xfc   : >> { %p1117_p13 = pnand %p1116_p12, %p1110_p9 }
  0xfe   : >> { %1120 = shalt.err (!%p1117_p13)  }
  0xff   : >> { %291 = dma.hbm_to_vmem [thread:$0]  %s280_s2, 32, %s289_s3, %s1524_s30, %s1407_s24, %s1407_s24, %s1408_s6 }
 0x100   : >> { %s296_s16 = sand.u32 7, %s1665_s23   ;;  %s827_s17 = sshll.u32 %s295_s19, 4 }
 0x101   : >> { %s298_s18 = sadd.s32 %s827_s17, %s296_s16  ;;  %s304_s7 = sadd.s32 %s829_s9, %s302_s28 }
 0x102   : >> { %s828_s8 = sshll.u32 %s298_s18, 4  ;;  %s305_s4 = sadd.s32 %s1494_s14, %s304_s7 }
 0x103   : >> { %s300_s20 = scalar_lea.hbm %s1947_s1, %s828_s8  ;;  %s306_s15 = scalar_lea.vmem [#allocation2], %s305_s4 }
 0x104   : >> { %s308_s22 = sshll.u32 %s306_s15, 4  ;;  %s1121_s5 = scalar_lea.hbm %s300_s20, 32  ;;  %s309_s22 = int_to_ptr.vmem [resolvable:$true] %s308_s22 }
 0x105   : >> { %p1122_p0 = scmp.ne.s32.totalorder %s300_s20, %s1121_s5  ;;  %p1124_p1 = scmp.lt.u32.totalorder %s300_s20, %s1947_s1 }
 0x106   : >> { %p1125_p2 = scmp.lt.u32.totalorder %s1531_s11, %s1121_s5  ;;  %p1127_p4 = scmp.lt.u32.totalorder %s1121_s5, %s300_s20 }
 0x108   : >> { %p1126_p3 = por %p1125_p2, %p1124_p1 }
 0x10a   : >> { %p1128_p5 = por %p1127_p4, %p1126_p3 }
 0x10c   : >> { %p1129_p6 = pnand %p1128_p5, %p1122_p0 }
 0x10e   : >> { %1132 = shalt.err (!%p1129_p6)  }
 0x10f   : >> { %s1133_s14 = scalar_lea.vmem %s309_s22, 32  ;;  %p1138_p8 = scmp.lt.s32.totalorder %s309_s22, %s1541_s26 }
 0x110   : >> { %p1134_p7 = scmp.ne.s32.totalorder %s309_s22, %s1133_s14  ;;  %p1139_p9 = scmp.lt.s32.totalorder %s1544_s27, %s1133_s14 }
 0x112   : >> { %p1140_p10 = por %p1139_p9, %p1138_p8 }
 0x114   : >> { %p1141_p11 = pnand %p1140_p10, %p1134_p7 }
 0x116   : >> { %1144 = shalt.err (!%p1141_p11)  }
 0x117   : >> { %311 = dma.hbm_to_vmem [thread:$0]  %s300_s20, 32, %s309_s22, %s1524_s30, %s1407_s24, %s1407_s24, %s1408_s6 }
 0x118   : >> { %s1975_s11 = sld [smem:[#allocation33_spill]] }
 0x11e   : >> { %s149_s13 = sadd.s32 1, %s1975_s11  }
 0x11f   : >> { %p146_p12 = scmp.ge.s32.totalorder %s149_s13, 2  }
 0x121   : > { %148 = sbr.rel (!%p146_p12) target bundleno = 54 (0x36), region = 118 }
 0x128 PF: > { %s1976_s23 = sld [smem:[#allocation24_spill]] }
 0x12e   : > { %s312_s3 = sadd.s32 1, %s1976_s23 }
 0x12f   : > { %p830_p13 = scmp.ge.s32.totalorder %s312_s3, 3 }
 0x131   : > { %316 = sbr.rel (%p830_p13) target bundleno = 563 (0x233), region = 39 }
 0x138   : > { %s1977_s26 = sld [smem:[#allocation25_spill]]  ;;  %s1978_s27 = sld [smem:[#allocation24_spill]] }
 0x139   : > { %s1706_s25 = smov 0  }
 0x13e   : > { %s317_s28 = smul.u32 48, %s1977_s26  ;;  %s867_s9 = sshll.u32 %s1978_s27, 4 }
 0x13f   : > { %s868_s2 = sadd.s32 16, %s867_s9 }
 0x140   : > { %s1704_s19 = sadd.s32 %s868_s2, %s317_s28 }
 0x141 LB: >> { %s1979_s30 = sld [smem:[#allocation32_spill]]  ;;  %1980 = sst [smem:[#allocation34_spill]] %s1399_s25  ;;  %s1399_s25 = sphi %s1706_s25, %s325_s25  }
 0x142   : >> { %s1716_s6 = sshll.u32 %s1399_s25, 3 }
 0x143   : >> { %s327_s13 = sadd.s32 %s1716_s6, %s1704_s19  ;;  %s335_s16 = sshrl.u32 %s1716_s6, 3 }
 0x144   : >> { %s328_s17 = sld [smem:[#allocation5 + %s327_s13]]  ;;  %s336_s18 = sand.u32 7, %s1716_s6  }
 0x145   : >> { %s835_s7 = sshll.u32 %s335_s16, 4  ;;  %s1723_s4 = sadd.s32 1, %s1716_s6 }
 0x146   : >> { %s338_s8 = sadd.s32 %s835_s7, %s336_s18  ;;  %s349_s29 = sadd.s32 %s1723_s4, %s1704_s19 }
 0x147   : >> { %s1981_s12 = ssub.s32 1, %s1979_s30  ;;  %s1728_s20 = sld [smem:[#allocation5 + %s349_s29]] }
 0x148   : >> { %s1713_s24 = sshll.u32 %s1981_s12, 5  ;;  %s357_s5 = sshrl.u32 %s1723_s4, 3 }
 0x149   : >> { %s340_s10 = sadd.s32 %s1713_s24, %s338_s8  ;;  %s358_s23 = sand.u32 7, %s1723_s4  }
 0x14a   : >> { %s341_s15 = scalar_lea.vmem [#allocation2], %s340_s10  ;;  %s329_s21 = sshrl.u32 %s328_s17, 3 }
 0x14b   : >> { %s344_s22 = sshll.u32 %s341_s15, 4  ;;  %s330_s0 = sand.u32 7, %s328_s17   ;;  %s1731_s22 = int_to_ptr.vmem [resolvable:$true] %s344_s22 }
 0x14c   : >> { %s833_s14 = sshll.u32 %s329_s21, 4  ;;  %s1734_s26 = sshll.u32 %s357_s5, 4 }
 0x14d   : >> { %s332_s11 = sadd.s32 %s833_s14, %s330_s0  ;;  %s351_s2 = sshrl.u32 %s1728_s20, 3 }
 0x14e   : >> { %s834_s3 = sshll.u32 %s332_s11, 4  ;;  %s1744_s13 = scalar_lea.sflag [#allocation3], %s1981_s12 }
 0x14f   : >> { %s1739_s9 = scalar_lea.hbm %s1947_s1, %s834_s3  ;;  %s1751_s7 = scalar_lea.hbm %s1947_s1, 976896 }
 0x150   : >> { %s1145_s16 = scalar_lea.hbm %s1739_s9, 32  ;;  %p1148_p1 = scmp.lt.u32.totalorder %s1739_s9, %s1947_s1 }
 0x151   : >> { %p1146_p0 = scmp.ne.s32.totalorder %s1739_s9, %s1145_s16  ;;  %p1149_p2 = scmp.lt.u32.totalorder %s1751_s7, %s1145_s16 }
 0x152   : >> { %p1151_p4 = scmp.lt.u32.totalorder %s1145_s16, %s1739_s9 }
 0x153   : >> { %p1150_p3 = por %p1149_p2, %p1148_p1 }
 0x155   : >> { %p1152_p5 = por %p1151_p4, %p1150_p3 }
 0x157   : >> { %p1153_p6 = pnand %p1152_p5, %p1146_p0 }
 0x159   : >> { %1156 = shalt.err (!%p1153_p6)  }
 0x15a   : >> { %s1157_s30 = scalar_lea.vmem %s1731_s22, 32  ;;  %s1409_s29 = smov [#allocation2]  }
 0x15b   : >> { %p1158_p7 = scmp.ne.s32.totalorder %s1731_s22, %s1157_s30  ;;  %s1159_s15 = sshll.u32 %s1409_s29, 4  ;;  %s1761_s15 = int_to_ptr.vmem [resolvable:$false] %s1159_s15 }
 0x15c   : >> { %s1764_s5 = scalar_lea.vmem %s1761_s15, 1024  ;;  %p1162_p8 = scmp.lt.s32.totalorder %s1731_s22, %s1761_s15 }
 0x15d   : >> { %p1163_p9 = scmp.lt.s32.totalorder %s1764_s5, %s1157_s30 }
 0x15f   : >> { %p1164_p10 = por %p1163_p9, %p1162_p8 }
 0x161   : >> { %p1165_p11 = pnand %p1164_p10, %p1158_p7 }
 0x163   : >> { %1168 = shalt.err (!%p1165_p11)  }
 0x164   : >> { %s1410_s21 = smov 128   ;;  %s1411_s0 = smov 1  }
 0x165   : >> { %347 = dma.hbm_to_vmem [thread:$0]  %s1739_s9, 32, %s1731_s22, %s1744_s13, %s1410_s21, %s1410_s21, %s1411_s0 }
 0x166   : >> { %s352_s14 = sand.u32 7, %s1728_s20   ;;  %s837_s11 = sshll.u32 %s351_s2, 4 }
 0x167   : >> { %s354_s3 = sadd.s32 %s837_s11, %s352_s14  ;;  %s360_s27 = sadd.s32 %s1734_s26, %s358_s23 }
 0x168   : >> { %s838_s28 = sshll.u32 %s354_s3, 4  ;;  %s361_s12 = sadd.s32 %s1713_s24, %s360_s27 }
 0x169   : >> { %s356_s18 = scalar_lea.hbm %s1947_s1, %s838_s28  ;;  %s362_s8 = scalar_lea.vmem [#allocation2], %s361_s12 }
 0x16a   : >> { %s364_s10 = sshll.u32 %s362_s8, 4  ;;  %s368_s30 = sadd.s32 2, %s1716_s6  ;;  %s365_s10 = int_to_ptr.vmem [resolvable:$true] %s364_s10 }
 0x16b   : >> { %s369_s29 = sadd.s32 %s368_s30, %s1704_s19  ;;  %s1169_s25 = scalar_lea.hbm %s356_s18, 32 }
 0x16c   : >> { %p1170_p12 = scmp.ne.s32.totalorder %s356_s18, %s1169_s25  ;;  %p1172_p13 = scmp.lt.u32.totalorder %s356_s18, %s1947_s1 }
 0x16d   : >> { %p1173_p0 = scmp.lt.u32.totalorder %s1751_s7, %s1169_s25  ;;  %p1175_p2 = scmp.lt.u32.totalorder %s1169_s25, %s356_s18 }
 0x16f   : >> { %p1174_p1 = por %p1173_p0, %p1172_p13 }
 0x171   : >> { %p1176_p3 = por %p1175_p2, %p1174_p1 }
 0x173   : >> { %p1177_p4 = pnand %p1176_p3, %p1170_p12 }
 0x175   : >> { %1180 = shalt.err (!%p1177_p4)  }
 0x176   : >> { %s1181_s4 = scalar_lea.vmem %s365_s10, 32  ;;  %p1186_p6 = scmp.lt.s32.totalorder %s365_s10, %s1761_s15 }
 0x177   : >> { %p1182_p5 = scmp.ne.s32.totalorder %s365_s10, %s1181_s4  ;;  %p1187_p7 = scmp.lt.s32.totalorder %s1764_s5, %s1181_s4 }
 0x179   : >> { %p1188_p8 = por %p1187_p7, %p1186_p6 }
 0x17b   : >> { %p1189_p9 = pnand %p1188_p8, %p1182_p5 }
 0x17d   : >> { %1192 = shalt.err (!%p1189_p9)  }
 0x17e   : >> { %367 = dma.hbm_to_vmem [thread:$0]  %s356_s18, 32, %s365_s10, %s1744_s13, %s1410_s21, %s1410_s21, %s1411_s0 }
 0x17f   : >> { %s370_s25 = sld [smem:[#allocation5 + %s369_s29]]  ;;  %s377_s20 = sshrl.u32 %s368_s30, 3 }
 0x180   : >> { %s378_s23 = sand.u32 7, %s368_s30   ;;  %s842_s26 = sshll.u32 %s377_s20, 4 }
 0x181   : >> { %s380_s2 = sadd.s32 %s842_s26, %s378_s23  ;;  %s1798_s14 = sadd.s32 3, %s1716_s6 }
 0x182   : >> { %s381_s11 = sadd.s32 %s1713_s24, %s380_s2  ;;  %s389_s3 = sadd.s32 %s1798_s14, %s1704_s19 }
 0x183   : >> { %s1803_s27 = sld [smem:[#allocation5 + %s389_s3]]  ;;  %s382_s28 = scalar_lea.vmem [#allocation2], %s381_s11 }
 0x184   : >> { %s384_s12 = sshll.u32 %s382_s28, 4  ;;  %s397_s16 = sshrl.u32 %s1798_s14, 3  ;;  %s385_s12 = int_to_ptr.vmem [resolvable:$true] %s384_s12 }
 0x185   : >> { %s371_s17 = sshrl.u32 %s370_s25, 3  ;;  %s372_s18 = sand.u32 7, %s370_s25  }
 0x186   : >> { %s840_s8 = sshll.u32 %s371_s17, 4  ;;  %s398_s30 = sand.u32 7, %s1798_s14  }
 0x187   : >> { %s374_s10 = sadd.s32 %s840_s8, %s372_s18  ;;  %s845_s22 = sshll.u32 %s397_s16, 4 }
 0x188   : >> { %s841_s29 = sshll.u32 %s374_s10, 4 }
 0x189   : >> { %s376_s20 = scalar_lea.hbm %s1947_s1, %s841_s29  ;;  %s391_s23 = sshrl.u32 %s1803_s27, 3 }
 0x18a   : >> { %s1193_s26 = scalar_lea.hbm %s376_s20, 32  ;;  %p1196_p11 = scmp.lt.u32.totalorder %s376_s20, %s1947_s1 }
 0x18b   : >> { %p1194_p10 = scmp.ne.s32.totalorder %s376_s20, %s1193_s26  ;;  %p1197_p12 = scmp.lt.u32.totalorder %s1751_s7, %s1193_s26 }
 0x18c   : >> { %p1199_p0 = scmp.lt.u32.totalorder %s1193_s26, %s376_s20 }
 0x18d   : >> { %p1198_p13 = por %p1197_p12, %p1196_p11 }
 0x18f   : >> { %p1200_p1 = por %p1199_p0, %p1198_p13 }
 0x191   : >> { %p1201_p2 = pnand %p1200_p1, %p1194_p10 }
 0x193   : >> { %1204 = shalt.err (!%p1201_p2)  }
 0x194   : >> { %s1205_s25 = scalar_lea.vmem %s385_s12, 32  ;;  %p1210_p4 = scmp.lt.s32.totalorder %s385_s12, %s1761_s15 }
 0x195   : >> { %p1206_p3 = scmp.ne.s32.totalorder %s385_s12, %s1205_s25  ;;  %p1211_p5 = scmp.lt.s32.totalorder %s1764_s5, %s1205_s25 }
 0x197   : >> { %p1212_p6 = por %p1211_p5, %p1210_p4 }
 0x199   : >> { %p1213_p7 = pnand %p1212_p6, %p1206_p3 }
 0x19b   : >> { %1216 = shalt.err (!%p1213_p7)  }
 0x19c   : >> { %387 = dma.hbm_to_vmem [thread:$0]  %s376_s20, 32, %s385_s12, %s1744_s13, %s1410_s21, %s1410_s21, %s1411_s0 }
 0x19d   : >> { %s392_s14 = sand.u32 7, %s1803_s27   ;;  %s843_s3 = sshll.u32 %s391_s23, 4 }
 0x19e   : >> { %s394_s28 = sadd.s32 %s843_s3, %s392_s14  ;;  %s400_s16 = sadd.s32 %s845_s22, %s398_s30 }
 0x19f   : >> { %s844_s17 = sshll.u32 %s394_s28, 4  ;;  %s401_s18 = sadd.s32 %s1713_s24, %s400_s16 }
 0x1a0   : >> { %s396_s29 = scalar_lea.hbm %s1947_s1, %s844_s17  ;;  %s402_s9 = scalar_lea.vmem [#allocation2], %s401_s18 }
 0x1a1   : >> { %s404_s4 = sshll.u32 %s402_s9, 4  ;;  %s408_s26 = sadd.s32 4, %s1716_s6  ;;  %s405_s4 = int_to_ptr.vmem [resolvable:$true] %s404_s4 }
 0x1a2   : >> { %s409_s2 = sadd.s32 %s408_s26, %s1704_s19  ;;  %s1217_s11 = scalar_lea.hbm %s396_s29, 32 }
 0x1a3   : >> { %p1218_p8 = scmp.ne.s32.totalorder %s396_s29, %s1217_s11  ;;  %p1220_p9 = scmp.lt.u32.totalorder %s396_s29, %s1947_s1 }
 0x1a4   : >> { %p1221_p10 = scmp.lt.u32.totalorder %s1751_s7, %s1217_s11  ;;  %p1223_p12 = scmp.lt.u32.totalorder %s1217_s11, %s396_s29 }
 0x1a6   : >> { %p1222_p11 = por %p1221_p10, %p1220_p9 }
 0x1a8   : >> { %p1224_p13 = por %p1223_p12, %p1222_p11 }
 0x1aa   : >> { %p1225_p0 = pnand %p1224_p13, %p1218_p8 }
 0x1ac   : >> { %1228 = shalt.err (!%p1225_p0)  }
 0x1ad   : >> { %s1229_s27 = scalar_lea.vmem %s405_s4, 32  ;;  %p1234_p2 = scmp.lt.s32.totalorder %s405_s4, %s1761_s15 }
 0x1ae   : >> { %p1230_p1 = scmp.ne.s32.totalorder %s405_s4, %s1229_s27  ;;  %p1235_p3 = scmp.lt.s32.totalorder %s1764_s5, %s1229_s27 }
 0x1b0   : >> { %p1236_p4 = por %p1235_p3, %p1234_p2 }
 0x1b2   : >> { %p1237_p5 = pnand %p1236_p4, %p1230_p1 }
 0x1b4   : >> { %1240 = shalt.err (!%p1237_p5)  }
 0x1b5   : >> { %407 = dma.hbm_to_vmem [thread:$0]  %s396_s29, 32, %s405_s4, %s1744_s13, %s1410_s21, %s1410_s21, %s1411_s0 }
 0x1b6   : >> { %s410_s30 = sld [smem:[#allocation5 + %s409_s2]]  ;;  %s417_s22 = sshrl.u32 %s408_s26, 3 }
 0x1b7   : >> { %s418_s20 = sand.u32 7, %s408_s26   ;;  %s848_s23 = sshll.u32 %s417_s22, 4 }
 0x1b8   : >> { %s420_s14 = sadd.s32 %s848_s23, %s418_s20  ;;  %s1839_s3 = sadd.s32 5, %s1716_s6 }
 0x1b9   : >> { %s421_s28 = sadd.s32 %s1713_s24, %s420_s14  ;;  %s429_s16 = sadd.s32 %s1839_s3, %s1704_s19 }
 0x1ba   : >> { %s1844_s17 = sld [smem:[#allocation5 + %s429_s16]]  ;;  %s422_s18 = scalar_lea.vmem [#allocation2], %s421_s28 }
 0x1bb   : >> { %s424_s8 = sshll.u32 %s422_s18, 4  ;;  %s437_s10 = sshrl.u32 %s1839_s3, 3  ;;  %s425_s8 = int_to_ptr.vmem [resolvable:$true] %s424_s8 }
 0x1bc   : >> { %s411_s29 = sshrl.u32 %s410_s30, 3  ;;  %s412_s9 = sand.u32 7, %s410_s30  }
 0x1bd   : >> { %s846_s4 = sshll.u32 %s411_s29, 4  ;;  %s438_s2 = sand.u32 7, %s1839_s3  }
 0x1be   : >> { %s414_s26 = sadd.s32 %s846_s4, %s412_s9  ;;  %s851_s25 = sshll.u32 %s437_s10, 4 }
 0x1bf   : >> { %s847_s11 = sshll.u32 %s414_s26, 4 }
 0x1c0   : >> { %s416_s22 = scalar_lea.hbm %s1947_s1, %s847_s11  ;;  %s431_s20 = sshrl.u32 %s1844_s17, 3 }
 0x1c1   : >> { %s1241_s23 = scalar_lea.hbm %s416_s22, 32  ;;  %p1244_p7 = scmp.lt.u32.totalorder %s416_s22, %s1947_s1 }
 0x1c2   : >> { %p1242_p6 = scmp.ne.s32.totalorder %s416_s22, %s1241_s23  ;;  %p1245_p8 = scmp.lt.u32.totalorder %s1751_s7, %s1241_s23 }
 0x1c3   : >> { %p1247_p10 = scmp.lt.u32.totalorder %s1241_s23, %s416_s22 }
 0x1c4   : >> { %p1246_p9 = por %p1245_p8, %p1244_p7 }
 0x1c6   : >> { %p1248_p11 = por %p1247_p10, %p1246_p9 }
 0x1c8   : >> { %p1249_p12 = pnand %p1248_p11, %p1242_p6 }
 0x1ca   : >> { %1252 = shalt.err (!%p1249_p12)  }
 0x1cb   : >> { %s1253_s30 = scalar_lea.vmem %s425_s8, 32  ;;  %p1258_p0 = scmp.lt.s32.totalorder %s425_s8, %s1761_s15 }
 0x1cc   : >> { %p1254_p13 = scmp.ne.s32.totalorder %s425_s8, %s1253_s30  ;;  %p1259_p1 = scmp.lt.s32.totalorder %s1764_s5, %s1253_s30 }
 0x1ce   : >> { %p1260_p2 = por %p1259_p1, %p1258_p0 }
 0x1d0   : >> { %p1261_p3 = pnand %p1260_p2, %p1254_p13 }
 0x1d2   : >> { %1264 = shalt.err (!%p1261_p3)  }
 0x1d3   : >> { %427 = dma.hbm_to_vmem [thread:$0]  %s416_s22, 32, %s425_s8, %s1744_s13, %s1410_s21, %s1410_s21, %s1411_s0 }
 0x1d4   : >> { %s432_s3 = sand.u32 7, %s1844_s17   ;;  %s849_s16 = sshll.u32 %s431_s20, 4 }
 0x1d5   : >> { %s434_s18 = sadd.s32 %s849_s16, %s432_s3  ;;  %s440_s10 = sadd.s32 %s851_s25, %s438_s2 }
 0x1d6   : >> { %s850_s29 = sshll.u32 %s434_s18, 4  ;;  %s441_s9 = sadd.s32 %s1713_s24, %s440_s10 }
 0x1d7   : >> { %s436_s11 = scalar_lea.hbm %s1947_s1, %s850_s29  ;;  %s442_s12 = scalar_lea.vmem [#allocation2], %s441_s9 }
 0x1d8   : >> { %s444_s27 = sshll.u32 %s442_s12, 4  ;;  %s448_s23 = sadd.s32 6, %s1716_s6  ;;  %s445_s27 = int_to_ptr.vmem [resolvable:$true] %s444_s27 }
 0x1d9   : >> { %s449_s14 = sadd.s32 %s448_s23, %s1704_s19  ;;  %s1265_s28 = scalar_lea.hbm %s436_s11, 32 }
 0x1da   : >> { %p1266_p4 = scmp.ne.s32.totalorder %s436_s11, %s1265_s28  ;;  %p1268_p5 = scmp.lt.u32.totalorder %s436_s11, %s1947_s1 }
 0x1db   : >> { %p1269_p6 = scmp.lt.u32.totalorder %s1751_s7, %s1265_s28  ;;  %p1271_p8 = scmp.lt.u32.totalorder %s1265_s28, %s436_s11 }
 0x1dd   : >> { %p1270_p7 = por %p1269_p6, %p1268_p5 }
 0x1df   : >> { %p1272_p9 = por %p1271_p8, %p1270_p7 }
 0x1e1   : >> { %p1273_p10 = pnand %p1272_p9, %p1266_p4 }
 0x1e3   : >> { %1276 = shalt.err (!%p1273_p10)  }
 0x1e4   : >> { %s1277_s17 = scalar_lea.vmem %s445_s27, 32  ;;  %p1282_p12 = scmp.lt.s32.totalorder %s445_s27, %s1761_s15 }
 0x1e5   : >> { %p1278_p11 = scmp.ne.s32.totalorder %s445_s27, %s1277_s17  ;;  %p1283_p13 = scmp.lt.s32.totalorder %s1764_s5, %s1277_s17 }
 0x1e7   : >> { %p1284_p0 = por %p1283_p13, %p1282_p12 }
 0x1e9   : >> { %p1285_p1 = pnand %p1284_p0, %p1278_p11 }
 0x1eb   : >> { %1288 = shalt.err (!%p1285_p1)  }
 0x1ec   : >> { %447 = dma.hbm_to_vmem [thread:$0]  %s436_s11, 32, %s445_s27, %s1744_s13, %s1410_s21, %s1410_s21, %s1411_s0 }
 0x1ed   : >> { %s450_s2 = sld [smem:[#allocation5 + %s449_s14]]  ;;  %s457_s25 = sshrl.u32 %s448_s23, 3 }
 0x1ee   : >> { %s458_s22 = sand.u32 7, %s448_s23   ;;  %s854_s20 = sshll.u32 %s457_s25, 4 }
 0x1ef   : >> { %s460_s3 = sadd.s32 %s854_s20, %s458_s22  ;;  %s1880_s16 = sadd.s32 7, %s1716_s6 }
 0x1f0   : >> { %s461_s18 = sadd.s32 %s1713_s24, %s460_s3  ;;  %s469_s10 = sadd.s32 %s1880_s16, %s1704_s19 }
 0x1f1   : >> { %s1885_s29 = sld [smem:[#allocation5 + %s469_s10]]  ;;  %s462_s9 = scalar_lea.vmem [#allocation2], %s461_s18 }
 0x1f2   : >> { %s464_s4 = sshll.u32 %s462_s9, 4  ;;  %s477_s26 = sshrl.u32 %s1880_s16, 3  ;;  %s465_s4 = int_to_ptr.vmem [resolvable:$true] %s464_s4 }
 0x1f3   : >> { %s451_s11 = sshrl.u32 %s450_s2, 3  ;;  %s452_s12 = sand.u32 7, %s450_s2  }
 0x1f4   : >> { %s852_s27 = sshll.u32 %s451_s11, 4  ;;  %s478_s14 = sand.u32 7, %s1880_s16  }
 0x1f5   : >> { %s454_s23 = sadd.s32 %s852_s27, %s452_s12  ;;  %s857_s28 = sshll.u32 %s477_s26, 4 }
 0x1f6   : >> { %s853_s6 = sshll.u32 %s454_s23, 4 }
 0x1f7   : >> { %s456_s17 = scalar_lea.hbm %s1947_s1, %s853_s6  ;;  %s471_s25 = sshrl.u32 %s1885_s29, 3 }
 0x1f8   : >> { %s1289_s22 = scalar_lea.hbm %s456_s17, 32  ;;  %p1292_p3 = scmp.lt.u32.totalorder %s456_s17, %s1947_s1 }
 0x1f9   : >> { %p1290_p2 = scmp.ne.s32.totalorder %s456_s17, %s1289_s22  ;;  %p1293_p4 = scmp.lt.u32.totalorder %s1751_s7, %s1289_s22 }
 0x1fa   : >> { %p1295_p6 = scmp.lt.u32.totalorder %s1289_s22, %s456_s17 }
 0x1fb   : >> { %p1294_p5 = por %p1293_p4, %p1292_p3 }
 0x1fd   : >> { %p1296_p7 = por %p1295_p6, %p1294_p5 }
 0x1ff   : >> { %p1297_p8 = pnand %p1296_p7, %p1290_p2 }
 0x201   : >> { %1300 = shalt.err (!%p1297_p8)  }
 0x202   : >> { %s1301_s2 = scalar_lea.vmem %s465_s4, 32  ;;  %p1306_p10 = scmp.lt.s32.totalorder %s465_s4, %s1761_s15 }
 0x203   : >> { %p1302_p9 = scmp.ne.s32.totalorder %s465_s4, %s1301_s2  ;;  %p1307_p11 = scmp.lt.s32.totalorder %s1764_s5, %s1301_s2 }
 0x205   : >> { %p1308_p12 = por %p1307_p11, %p1306_p10 }
 0x207   : >> { %p1309_p13 = pnand %p1308_p12, %p1302_p9 }
 0x209   : >> { %1312 = shalt.err (!%p1309_p13)  }
 0x20a   : >> { %467 = dma.hbm_to_vmem [thread:$0]  %s456_s17, 32, %s465_s4, %s1744_s13, %s1410_s21, %s1410_s21, %s1411_s0 }
 0x20b   : >> { %s472_s16 = sand.u32 7, %s1885_s29   ;;  %s855_s18 = sshll.u32 %s471_s25, 4 }
 0x20c   : >> { %s474_s10 = sadd.s32 %s855_s18, %s472_s16  ;;  %s480_s9 = sadd.s32 %s857_s28, %s478_s14 }
 0x20d   : >> { %s856_s26 = sshll.u32 %s474_s10, 4  ;;  %s481_s11 = sadd.s32 %s1713_s24, %s480_s9 }
 0x20e   : >> { %s476_s23 = scalar_lea.hbm %s1947_s1, %s856_s26  ;;  %s482_s6 = scalar_lea.vmem [#allocation2], %s481_s11 }
 0x20f   : >> { %s484_s30 = sshll.u32 %s482_s6, 4  ;;  %s1313_s8 = scalar_lea.hbm %s476_s23, 32  ;;  %s485_s30 = int_to_ptr.vmem [resolvable:$true] %s484_s30 }
 0x210   : >> { %p1314_p0 = scmp.ne.s32.totalorder %s476_s23, %s1313_s8  ;;  %p1316_p1 = scmp.lt.u32.totalorder %s476_s23, %s1947_s1 }
 0x211   : >> { %p1317_p2 = scmp.lt.u32.totalorder %s1751_s7, %s1313_s8  ;;  %p1319_p4 = scmp.lt.u32.totalorder %s1313_s8, %s476_s23 }
 0x213   : >> { %p1318_p3 = por %p1317_p2, %p1316_p1 }
 0x215   : >> { %p1320_p5 = por %p1319_p4, %p1318_p3 }
 0x217   : >> { %p1321_p6 = pnand %p1320_p5, %p1314_p0 }
 0x219   : >> { %1324 = shalt.err (!%p1321_p6)  }
 0x21a   : >> { %s1325_s24 = scalar_lea.vmem %s485_s30, 32  ;;  %p1330_p8 = scmp.lt.s32.totalorder %s485_s30, %s1761_s15 }
 0x21b   : >> { %p1326_p7 = scmp.ne.s32.totalorder %s485_s30, %s1325_s24  ;;  %p1331_p9 = scmp.lt.s32.totalorder %s1764_s5, %s1325_s24 }
 0x21d   : >> { %p1332_p10 = por %p1331_p9, %p1330_p8 }
 0x21f   : >> { %p1333_p11 = pnand %p1332_p10, %p1326_p7 }
 0x221   : >> { %1336 = shalt.err (!%p1333_p11)  }
 0x222   : >> { %487 = dma.hbm_to_vmem [thread:$0]  %s476_s23, 32, %s485_s30, %s1744_s13, %s1410_s21, %s1410_s21, %s1411_s0 }
 0x223   : >> { %s1982_s7 = sld [smem:[#allocation34_spill]] }
 0x229   : >> { %s325_s25 = sadd.s32 1, %s1982_s7  }
 0x22a   : >> { %p322_p12 = scmp.ge.s32.totalorder %s325_s25, 2  }
 0x22c   : > { %324 = sbr.rel (!%p322_p12) target bundleno = 321 (0x141), region = 129 }
 0x233 PF: > { %s1401_s29 = smov 0  }
 0x234 LB: >> { %s1983_s15 = sld [smem:[#allocation32_spill]]  ;;  %s1403_s29 = sphi %s1401_s29, %s493_s29  }
 0x23a   : >> { %s494_s5 = scalar_lea.sflag [#allocation3], %s1983_s15 }
 0x23b   : >> { %1371 = dma.done.wait %s494_s5, 256 }
 0x23c   : >> { %1372 = vsyncadd %s494_s5, 4294967040  ;;  %s493_s29 = sadd.s32 1, %s1403_s29  }
 0x23d   : >> { %p490_p13 = scmp.ge.s32.totalorder %s493_s29, 2  }
 0x23e   : > { %s1984_s13 = sld [smem:[#allocation24_spill]] (%p490_p13)  ;;  %s1985_s21 = sld [smem:[#allocation32_spill]] (%p490_p13) }
 0x23f   : > { %492 = sbr.rel (!%p490_p13) target bundleno = 564 (0x234), region = 140  ;;  %s1986_s28 = sld [smem:[#allocation31_spill]] (%p490_p13) }
 0x240   : > { %s1987_s2 = sld [smem:[#allocation35_spill]] (%p490_p13) }
 0x244   : > { %s858_s0 = sshll.u32 (%p490_p13), %s1984_s13, 4  ;;  %s869_s4 = sshll.u32 (%p490_p13), %s1985_s21, 5 }
 0x245   : > { %s520_s14 = sshra.s32 (%p490_p13), %s858_s0, 3  ;;  %s515_s17 = scalar_lea.vmem (%p490_p13), [#allocation2], %s869_s4 }
 0x246   : > { %v516_v0 = vld [vmem:[%s515_s17] sm:$0xff]  ;;  %s870_s19 = sshll.u32 %s520_s14, 4  ;;  %v517_v1 = vld [vmem:[%s515_s17 + $0x8] sm:$0xff]  ;;  %v518_v2 = vld [vmem:[%s515_s17 + $0x10] sm:$0xff] }
 0x247   : > { %s524_s16 = scalar_lea.vmem %s1987_s2, %s870_s19  ;;  %v519_v3 = vld [vmem:[%s515_s17 + $0x18] sm:$0xff] }
 0x248   : > { %v525_v4 = vld [vmem:[%s524_s16] sm:$0xff]  ;;  %v526_v5 = vld [vmem:[%s524_s16 + $0x8] sm:$0xff]  ;;  %v527_v6 = vld [vmem:[%s524_s16 + $0x10] sm:$0xff] }
 0x249   : > { %v529_v7 = vadd.f32 %v525_v4, %v516_v0  ;;  %v530_v8 = vadd.f32 %v526_v5, %v517_v1  ;;  %v531_v9 = vadd.f32 %v527_v6, %v518_v2  ;;  %v528_v10 = vld [vmem:[%s524_s16 + $0x18] sm:$0xff] }
 0x24a   : > { %v532_v11 = vadd.f32 %v528_v10, %v519_v3 }
 0x24b   : > { %533 = vst [vmem:[%s1986_s28] sm:$0xff] %v529_v7  ;;  %534 = vst [vmem:[%s1986_s28 + $0x8] sm:$0xff] %v530_v8 }
 0x24c   : > { %535 = vst [vmem:[%s1986_s28 + $0x10] sm:$0xff] %v531_v9  ;;  %536 = vst [vmem:[%s1986_s28 + $0x18] sm:$0xff] %v532_v11 }
 0x24d PF: > { %s1988_s18 = sld [smem:[#allocation28_spill]]  ;;  %s1989_s17 = sld [smem:[#allocation26_spill]] }
 0x24e   : > { %s1991_s19 = sld [smem:[#allocation29_spill]]  ;;  %s1992_s0 = sld [smem:[#allocation30_spill]] }
 0x253   : > { %s19_s20 = sadd.s32 1, %s1988_s18   ;;  %s1990_s18 = sld [smem:[#allocation27_spill]] }
 0x254   : > { %p16_p0 = scmp.ge.s32.totalorder %s19_s20, 8  }
 0x256   :  { %18 = sbr.rel (!%p16_p0) target bundleno = 19 (0x13), region = 151 }
 0x25d   :  { %569 = vsyncmov [#allocation3] }
 0x260   :  { %s570_s10 = vpop.sfrf %569 }
 0x261   :  { %p865_p1 = scmp.ne.s32.totalorder %s570_s10, 0 }
 0x263   :  { %574 = shalt.err (%p865_p1)  }
 0x264   :  { %576 = vsyncmov [#allocation3 + $0x1] }
 0x267   :  { %s577_s9 = vpop.sfrf %576 }
 0x268   :  { %p866_p2 = scmp.ne.s32.totalorder %s577_s9, 0 }
 0x26a   :  { %581 = shalt.err (%p866_p2)  }

</bundles_post_ra>
